<compile_context>
chip_gen: v7x
topology: tpu7x:2x2x1
jax: 0.10.0
libtpu: 0.0.40
codegen_flags: <defaults>
</compile_context>

<pallas_src>
import functools
import math

import jax
import jax.numpy as jnp
import numpy as np
from jax.experimental import pallas as pl
from jax.experimental.pallas import tpu as pltpu


# ----------------------------------------------------------------------------
# Kernel 1: QKV projection + rotary (+ folded softmax scale on Q), bf16 out.
# Grid: (batch, weight-col-blocks, row-blocks).  Runs ONCE over the sequence.
# ----------------------------------------------------------------------------
def _qkv_proj_kernel(x_ref, wq_ref, wk_ref, wv_ref,
                     cos_q_ref, sin_q_ref, cos_k_ref, sin_k_ref,
                     q_ref, k_ref, v_ref, *, heads_per_block, head_dim):
    f32 = jnp.float32

    x = x_ref[0]                      # (TR, D)  bf16
    wq = wq_ref[...]                  # (D, CB)  bf16, half-layout permuted cols
    wk = wk_ref[...]                  # (D, CB)  bf16, half-layout permuted cols
    wv = wv_ref[...]                  # (D, CB)  bf16

    # bf16 operands on the MXU, f32 accumulation.
    q = jnp.dot(x, wq, preferred_element_type=f32)    # (TR, CB) f32
    k = jnp.dot(x, wk, preferred_element_type=f32)
    v = jnp.dot(x, wv, preferred_element_type=f32)

    cos_q = cos_q_ref[...]            # (TR, head_dim) f32, * 1/sqrt(head_dim)
    sin_q = sin_q_ref[...]            # (TR, head_dim) f32, sign + scale folded
    cos_k = cos_k_ref[...]            # (TR, head_dim) f32
    sin_k = sin_k_ref[...]            # (TR, head_dim) f32, sign folded
    half = head_dim // 2

    # Rotary in the half layout: rot(x) = x*cos + roll(x, hd/2)*sin_signed.
    # roll goes to the XLU (free slot); no DxD rotation matmul.
    for h in range(heads_per_block):  # static, lane-aligned slices
        lo = h * head_dim
        hi = lo + head_dim
        qh = q[:, lo:hi]
        kh = k[:, lo:hi]
        qh = qh * cos_q + pltpu.roll(qh, shift=half, axis=1) * sin_q
        kh = kh * cos_k + pltpu.roll(kh, shift=half, axis=1) * sin_k
        q_ref[0, :, lo:hi] = qh.astype(q_ref.dtype)
        k_ref[0, :, lo:hi] = kh.astype(k_ref.dtype)
    v_ref[0] = v.astype(v_ref.dtype)


# ----------------------------------------------------------------------------
# Kernel 2: flash attention (online softmax over kv blocks) + fused wo.
# Grid: (batch, q-blocks, kv-blocks), kv innermost / "arbitrary".
# ----------------------------------------------------------------------------
def _flash_attn_kernel(q_ref, k_ref, v_ref, wo_ref, out_ref,
                       m_ref, l_ref, acc_ref, *, n_heads, head_dim):
    f32 = jnp.float32
    bf16 = jnp.bfloat16
    qi = pl.program_id(1)
    ki = pl.program_id(2)

    @pl.when(ki == 0)
    def _init():
        m_ref[...] = jnp.full_like(m_ref, -jnp.inf)
        l_ref[...] = jnp.zeros_like(l_ref)
        acc_ref[...] = jnp.zeros_like(acc_ref)

    # Causal block skip: kv blocks strictly above the diagonal do no work
    # (and their DMA is elided by the clamped index_map in the wrapper).
    @pl.when(ki <= qi)
    def _compute():
        q = q_ref[0]                  # (TQ, D) bf16, rotary + 1/sqrt(hd) applied
        k = k_ref[0]                  # (TK, D) bf16, rotary applied
        v = v_ref[0]                  # (TK, D) bf16
        tq = q.shape[0]
        tk = k.shape[0]

        # Causal mask generated in-kernel (no SxS HBM traffic).
        row = qi * tq + jax.lax.broadcasted_iota(jnp.int32, (tq, tk), 0)
        col = ki * tk + jax.lax.broadcasted_iota(jnp.int32, (tq, tk), 1)
        causal = col <= row
        neg_big = jnp.float32(-1e30)

        for h in range(n_heads):      # static, lane-aligned slices
            lo = h * head_dim
            hi = lo + head_dim
            sc = jax.lax.dot_general(
                q[:, lo:hi], k[:, lo:hi],
                dimension_numbers=(((1,), (1,)), ((), ())),
                preferred_element_type=f32)            # (TQ, TK) f32
            sc = jnp.where(causal, sc, neg_big)

            # Online softmax update (f32).
            m_prev = m_ref[h]                          # (TQ, 1)
            l_prev = l_ref[h]
            m_new = jnp.maximum(m_prev, jnp.max(sc, axis=-1, keepdims=True))
            alpha = jnp.exp(m_prev - m_new)
            p = jnp.exp(sc - m_new)
            l_ref[h] = alpha * l_prev + jnp.sum(p, axis=-1, keepdims=True)
            m_ref[h] = m_new
            acc_ref[:, lo:hi] = alpha * acc_ref[:, lo:hi] + jnp.dot(
                p.astype(bf16), v[:, lo:hi], preferred_element_type=f32)

    # Last needed kv block for this q block (TQ == TK) -> normalize + wo.
    @pl.when(ki == qi)
    def _finalize():
        for h in range(n_heads):
            lo = h * head_dim
            hi = lo + head_dim
            # Normalize in the acc/ctx scratch (no concatenate, flat vreg use).
            acc_ref[:, lo:hi] = acc_ref[:, lo:hi] * pl.reciprocal(
                l_ref[h], approx=True)
        ctx = acc_ref[...].astype(bf16)                # (TQ, D)
        out = jnp.dot(ctx, wo_ref[...], preferred_element_type=f32)
        out_ref[0] = out.astype(out_ref.dtype)


# ----------------------------------------------------------------------------
# Wrapper
# ----------------------------------------------------------------------------
def attention_forward(x, wq, wk, wv, wo, freqs_cis, *, n_heads, head_dim,
                      q_block=128, kv_block=128, row_block=128,
                      proj_col_block=None):
    B, S, D = x.shape
    assert D == n_heads * head_dim
    assert head_dim % 2 == 0
    # Lane alignment (head_dim % 128 == 0, D % 128 == 0) keeps the per-head
    # slices / rolls tile-aligned and the output stores lane-dense.
    assert q_block == kv_block, "causal block-skip assumes square tiles"
    assert S % q_block == 0 and S % row_block == 0
    cb = D if proj_col_block is None else proj_col_block
    assert cb % head_dim == 0 and D % cb == 0
    heads_per_block = cb // head_dim

    bf16 = jnp.bfloat16
    f32 = jnp.float32

    # ---- host-side prep (cheap XLA ops, run once per call) -----------------
    # Per-head column permutation of wq/wk: interleaved (re, im, re, im, ...)
    # -> half layout ([all re | all im]).  Scores (and the output) are
    # invariant because q and k receive the same per-head permutation.
    perm = np.concatenate([
        h * head_dim + np.concatenate([np.arange(0, head_dim, 2),
                                       np.arange(1, head_dim, 2)])
        for h in range(n_heads)])
    wq_p = jnp.asarray(wq)[:, perm].astype(bf16)   # bf16 weights from the host
    wk_p = jnp.asarray(wk)[:, perm].astype(bf16)
    wv_b = wv.astype(bf16)
    wo_b = wo.astype(bf16)
    x_b = x.astype(bf16)

    cos = jnp.real(freqs_cis).astype(f32)          # (S, head_dim//2)
    sin = jnp.imag(freqs_cis).astype(f32)
    cos_half = jnp.concatenate([cos, cos], axis=-1)        # (S, head_dim)
    sin_half = jnp.concatenate([-sin, sin], axis=-1)       # sign folded in
    scale = 1.0 / math.sqrt(head_dim)
    cos_q = cos_half * scale                       # softmax scale folded into Q
    sin_q = sin_half * scale

    compiler_params = pltpu.CompilerParams(
        dimension_semantics=("parallel", "parallel", "arbitrary"),
        vmem_limit_bytes=48 * 1024 * 1024)         # legal on v5e/v6e/v7x

    # ---- pass 1: QKV projection + rotary (once per row block) --------------
    n_rb = S // row_block
    n_cb = D // cb
    w_spec = pl.BlockSpec((D, cb), lambda b, c, r: (0, c))
    tab_spec = pl.BlockSpec((row_block, head_dim), lambda b, c, r: (r, 0))
    q_bf, k_bf, v_bf = pl.pallas_call(
        functools.partial(_qkv_proj_kernel,
                          heads_per_block=heads_per_block, head_dim=head_dim),
        out_shape=(jax.ShapeDtypeStruct((B, S, D), bf16),) * 3,
        grid=(B, n_cb, n_rb),
        in_specs=[
            pl.BlockSpec((1, row_block, D), lambda b, c, r: (b, r, 0)),  # x
            w_spec, w_spec, w_spec,                                      # wq wk wv
            tab_spec, tab_spec, tab_spec, tab_spec,                      # cos_q sin_q cos_k sin_k
        ],
        out_specs=(pl.BlockSpec((1, row_block, cb), lambda b, c, r: (b, r, c)),) * 3,
        compiler_params=pltpu.CompilerParams(
            dimension_semantics=("parallel", "parallel", "parallel"),
            vmem_limit_bytes=48 * 1024 * 1024),
    )(x_b, wq_p, wk_p, wv_b, cos_q, sin_q, cos_half, sin_half)

    # ---- pass 2: flash attention + fused wo ---------------------------------
    n_qb = S // q_block
    # Clamp the kv block index for skipped (fully-masked) blocks so the block
    # index repeats and the pipeline elides the DMA.
    kv_spec = pl.BlockSpec((1, kv_block, D),
                           lambda b, qi, ki: (b, jnp.minimum(ki, qi), 0))
    out = pl.pallas_call(
        functools.partial(_flash_attn_kernel,
                          n_heads=n_heads, head_dim=head_dim),
        out_shape=jax.ShapeDtypeStruct((B, S, D), x.dtype),
        grid=(B, n_qb, n_qb),
        in_specs=[
            pl.BlockSpec((1, q_block, D), lambda b, qi, ki: (b, qi, 0)),   # Q
            kv_spec,                                                       # K
            kv_spec,                                                       # V
            pl.BlockSpec((D, D), lambda b, qi, ki: (0, 0)),                # wo
        ],
        out_specs=pl.BlockSpec((1, q_block, D), lambda b, qi, ki: (b, qi, 0)),
        scratch_shapes=[
            pltpu.VMEM((n_heads, q_block, 1), f32),   # m (running max)
            pltpu.VMEM((n_heads, q_block, 1), f32),   # l (running sum)
            pltpu.VMEM((q_block, D), f32),            # acc / ctx buffer
        ],
        compiler_params=compiler_params,
    )(q_bf, k_bf, v_bf, wo_b)
    return out


# ----------------------------------------------------------------------------
# Pure-JAX reference mirroring the PyTorch module (complex rotary, f32)
# ----------------------------------------------------------------------------
def reference_attention(x, wq, wk, wv, wo, freqs_cis, *, n_heads, head_dim):
    B, S, D = x.shape
    xq = x @ wq
    xk = x @ wk
    xv = x @ wv
    xq = xq.reshape(B, S, n_heads, head_dim)
    xk = xk.reshape(B, S, n_heads, head_dim)
    xv = xv.reshape(B, S, n_heads, head_dim)

    def rot(t):
        tc = t.reshape(B, S, n_heads, head_dim // 2, 2)
        tc = tc[..., 0] + 1j * tc[..., 1]
        fc = freqs_cis.reshape(1, S, 1, head_dim // 2)
        to = tc * fc
        return jnp.stack([jnp.real(to), jnp.imag(to)], axis=-1).reshape(
            B, S, n_heads, head_dim)

    xq, xk = rot(xq), rot(xk)

    xq = jnp.transpose(xq, (0, 2, 1, 3))   # (B, H, S, hd)
    xk = jnp.transpose(xk, (0, 2, 1, 3))
    xv = jnp.transpose(xv, (0, 2, 1, 3))

    scores = jnp.einsum('bhqd,bhkd->bhqk', xq, xk) / math.sqrt(head_dim)
    r = jnp.arange(S)[:, None]
    c = jnp.arange(S)[None, :]
    mask = jnp.where(c > r, -jnp.inf, 0.0).astype(jnp.float32)
    scores = scores + mask[None, None]
    probs = jax.nn.softmax(scores.astype(jnp.float32), axis=-1)
    out = jnp.einsum('bhqk,bhkd->bhqd', probs, xv)
    out = jnp.transpose(out, (0, 2, 1, 3)).reshape(B, S, D)
    return out @ wo


# ----------------------------------------------------------------------------
# Main
# ----------------------------------------------------------------------------
if __name__ == "__main__":
    # Small but lane-aligned config: dim=256, 2 heads -> head_dim=128, S=256.
    # (At production shapes use 256-sized q/kv/row blocks and a 512-ish
    #  proj_col_block.)
    B, S, D, H = 2, 256, 256, 2
    HD = D // H          # 128
    TQ = 128             # q/kv block -> attention grid (B, 2, 2)

    key = jax.random.PRNGKey(0)
    kx, kq, kk, kv, ko = jax.random.split(key, 5)

    x = jax.random.normal(kx, (B, S, D), dtype=jnp.float32)
    # weights stored as (in_features, out_features)
    wq = jax.random.normal(kq, (D, D), dtype=jnp.float32) * (1.0 / math.sqrt(D))
    wk = jax.random.normal(kk, (D, D), dtype=jnp.float32) * (1.0 / math.sqrt(D))
    wv = jax.random.normal(kv, (D, D), dtype=jnp.float32) * (1.0 / math.sqrt(D))
    wo = jax.random.normal(ko, (D, D), dtype=jnp.float32) * (1.0 / math.sqrt(D))

    # Rotary tables (LLaMA precompute_freqs_cis, theta=10000), shape (S, HD//2).
    inv_freq = 1.0 / (10000.0 ** (np.arange(0, HD, 2, dtype=np.float32) / HD))
    t = np.arange(S, dtype=np.float32)
    freqs = np.outer(t, inv_freq)                       # (S, HD//2)
    freqs_cis = jnp.asarray(np.cos(freqs) + 1j * np.sin(freqs))

    out = attention_forward(x, wq, wk, wv, wo, freqs_cis,
                            n_heads=H, head_dim=HD,
                            q_block=TQ, kv_block=TQ, row_block=TQ,
                            proj_col_block=128)
    out = jax.block_until_ready(out)

    ref = reference_attention(x, wq, wk, wv, wo, freqs_cis,
                              n_heads=H, head_dim=HD)
    ref = jax.block_until_ready(ref)

    # Kernel uses bf16 MXU operands (f32 accumulation) and an approx
    # reciprocal for the softmax denominator -> looser tolerance than pure
    # f32; structural bugs would be O(1) off.
    np.testing.assert_allclose(np.asarray(out), np.asarray(ref),
                               rtol=5e-2, atol=5e-2)
    print("KERNEL_OK")
</pallas_src>

<mosaic_0001>
module attributes {stable_mosaic.version = 11 : i64} {
  func.func @_qkv_proj_kernel(%arg0: i32, %arg1: i32, %arg2: i32, %arg3: memref<1x128x256xbf16, #tpu.memory_space<vmem>>, %arg4: memref<256x128xbf16, #tpu.memory_space<vmem>>, %arg5: memref<256x128xbf16, #tpu.memory_space<vmem>>, %arg6: memref<256x128xbf16, #tpu.memory_space<vmem>>, %arg7: memref<128x128xf32, #tpu.memory_space<vmem>>, %arg8: memref<128x128xf32, #tpu.memory_space<vmem>>, %arg9: memref<128x128xf32, #tpu.memory_space<vmem>>, %arg10: memref<128x128xf32, #tpu.memory_space<vmem>>, %arg11: memref<1x128x128xbf16, #tpu.memory_space<vmem>>, %arg12: memref<1x128x128xbf16, #tpu.memory_space<vmem>>, %arg13: memref<1x128x128xbf16, #tpu.memory_space<vmem>>) attributes {dimension_semantics = [#tpu.dimension_semantics<parallel>, #tpu.dimension_semantics<parallel>, #tpu.dimension_semantics<parallel>], iteration_bounds = array<i64: 2, 2, 2>, scalar_prefetch = 0 : i64, scratch_operands = 0 : i64, tpu.core_type = #tpu.core_type<tc>, window_params = [{transform_indices = @transform_0, window_bounds = array<i64: 1, 128, 256>}, {transform_indices = @transform_1, window_bounds = array<i64: 256, 128>}, {transform_indices = @transform_2, window_bounds = array<i64: 256, 128>}, {transform_indices = @transform_3, window_bounds = array<i64: 256, 128>}, {transform_indices = @transform_4, window_bounds = array<i64: 128, 128>}, {transform_indices = @transform_5, window_bounds = array<i64: 128, 128>}, {transform_indices = @transform_6, window_bounds = array<i64: 128, 128>}, {transform_indices = @transform_7, window_bounds = array<i64: 128, 128>}, {transform_indices = @transform_8, window_bounds = array<i64: 1, 128, 128>}, {transform_indices = @transform_9, window_bounds = array<i64: 1, 128, 128>}, {transform_indices = @transform_10, window_bounds = array<i64: 1, 128, 128>}]} {
    %c0 = arith.constant 0 : index
    %c0_0 = arith.constant 0 : index
    %c0_1 = arith.constant 0 : index
    %0 = vector.load %arg3[%c0, %c0_0, %c0_1] : memref<1x128x256xbf16, #tpu.memory_space<vmem>>, vector<1x128x256xbf16>
    %1 = vector.shape_cast %0 : vector<1x128x256xbf16> to vector<128x256xbf16>
    %c0_2 = arith.constant 0 : index
    %c0_3 = arith.constant 0 : index
    %2 = vector.load %arg4[%c0_2, %c0_3] : memref<256x128xbf16, #tpu.memory_space<vmem>>, vector<256x128xbf16>
    %c0_4 = arith.constant 0 : index
    %c0_5 = arith.constant 0 : index
    %3 = vector.load %arg5[%c0_4, %c0_5] : memref<256x128xbf16, #tpu.memory_space<vmem>>, vector<256x128xbf16>
    %c0_6 = arith.constant 0 : index
    %c0_7 = arith.constant 0 : index
    %4 = vector.load %arg6[%c0_6, %c0_7] : memref<256x128xbf16, #tpu.memory_space<vmem>>, vector<256x128xbf16>
    %cst = arith.constant dense<0.000000e+00> : vector<128x128xf32>
    %5 = tpu.matmul %1, %2, %cst {dimension_numbers = #tpu.dot_dimension_numbers<[1], [0], [0], [1], [0, 0, 1, 1], [], []>} : vector<128x256xbf16>, vector<256x128xbf16>, vector<128x128xf32> -> vector<128x128xf32>
    %cst_8 = arith.constant dense<0.000000e+00> : vector<128x128xf32>
    %6 = tpu.matmul %1, %3, %cst_8 {dimension_numbers = #tpu.dot_dimension_numbers<[1], [0], [0], [1], [0, 0, 1, 1], [], []>} : vector<128x256xbf16>, vector<256x128xbf16>, vector<128x128xf32> -> vector<128x128xf32>
    %cst_9 = arith.constant dense<0.000000e+00> : vector<128x128xf32>
    %7 = tpu.matmul %1, %4, %cst_9 {dimension_numbers = #tpu.dot_dimension_numbers<[1], [0], [0], [1], [0, 0, 1, 1], [], []>} : vector<128x256xbf16>, vector<256x128xbf16>, vector<128x128xf32> -> vector<128x128xf32>
    %c0_10 = arith.constant 0 : index
    %c0_11 = arith.constant 0 : index
    %8 = vector.load %arg7[%c0_10, %c0_11] : memref<128x128xf32, #tpu.memory_space<vmem>>, vector<128x128xf32>
    %c0_12 = arith.constant 0 : index
    %c0_13 = arith.constant 0 : index
    %9 = vector.load %arg8[%c0_12, %c0_13] : memref<128x128xf32, #tpu.memory_space<vmem>>, vector<128x128xf32>
    %c0_14 = arith.constant 0 : index
    %c0_15 = arith.constant 0 : index
    %10 = vector.load %arg9[%c0_14, %c0_15] : memref<128x128xf32, #tpu.memory_space<vmem>>, vector<128x128xf32>
    %c0_16 = arith.constant 0 : index
    %c0_17 = arith.constant 0 : index
    %11 = vector.load %arg10[%c0_16, %c0_17] : memref<128x128xf32, #tpu.memory_space<vmem>>, vector<128x128xf32>
    %12 = arith.mulf %5, %8 : vector<128x128xf32>
    %c64_i32 = arith.constant 64 : i32
    %13 = tpu.dynamic_rotate %5 by %c64_i32 dim 1 : vector<128x128xf32>, i32 -> vector<128x128xf32>
    %14 = arith.mulf %13, %9 : vector<128x128xf32>
    %15 = arith.addf %12, %14 : vector<128x128xf32>
    %16 = arith.mulf %6, %10 : vector<128x128xf32>
    %c64_i32_18 = arith.constant 64 : i32
    %17 = tpu.dynamic_rotate %6 by %c64_i32_18 dim 1 : vector<128x128xf32>, i32 -> vector<128x128xf32>
    %18 = arith.mulf %17, %11 : vector<128x128xf32>
    %19 = arith.addf %16, %18 : vector<128x128xf32>
    %20 = arith.truncf %15 : vector<128x128xf32> to vector<128x128xbf16>
    %c0_19 = arith.constant 0 : index
    %c0_20 = arith.constant 0 : index
    %c0_21 = arith.constant 0 : index
    %21 = vector.load %arg11[%c0_19, %c0_20, %c0_21] : memref<1x128x128xbf16, #tpu.memory_space<vmem>>, vector<1x128x128xbf16>
    %22 = vector.shape_cast %21 : vector<1x128x128xbf16> to vector<128x128xbf16>
    %23 = vector.shape_cast %20 : vector<128x128xbf16> to vector<1x128x128xbf16>
    tpu.vector_store %arg11[%c0_19, %c0_20, %c0_21], %23 {strides = array<i32>} : memref<1x128x128xbf16, #tpu.memory_space<vmem>>, vector<1x128x128xbf16>,
    %24 = arith.truncf %19 : vector<128x128xf32> to vector<128x128xbf16>
    %c0_22 = arith.constant 0 : index
    %c0_23 = arith.constant 0 : index
    %c0_24 = arith.constant 0 : index
    %25 = vector.load %arg12[%c0_22, %c0_23, %c0_24] : memref<1x128x128xbf16, #tpu.memory_space<vmem>>, vector<1x128x128xbf16>
    %26 = vector.shape_cast %25 : vector<1x128x128xbf16> to vector<128x128xbf16>
    %27 = vector.shape_cast %24 : vector<128x128xbf16> to vector<1x128x128xbf16>
    tpu.vector_store %arg12[%c0_22, %c0_23, %c0_24], %27 {strides = array<i32>} : memref<1x128x128xbf16, #tpu.memory_space<vmem>>, vector<1x128x128xbf16>,
    %28 = arith.truncf %7 : vector<128x128xf32> to vector<128x128xbf16>
    %c0_25 = arith.constant 0 : index
    %c0_26 = arith.constant 0 : index
    %c0_27 = arith.constant 0 : index
    %29 = vector.load %arg13[%c0_25, %c0_26, %c0_27] : memref<1x128x128xbf16, #tpu.memory_space<vmem>>, vector<1x128x128xbf16>
    %30 = vector.shape_cast %29 : vector<1x128x128xbf16> to vector<128x128xbf16>
    %31 = vector.shape_cast %28 : vector<128x128xbf16> to vector<1x128x128xbf16>
    tpu.vector_store %arg13[%c0_25, %c0_26, %c0_27], %31 {strides = array<i32>} : memref<1x128x128xbf16, #tpu.memory_space<vmem>>, vector<1x128x128xbf16>,
    return
  }
  func.func @transform_0(%arg0: i32, %arg1: i32, %arg2: i32) -> (i32, i32, i32) {
    %c0_i32 = arith.constant 0 : i32
    %c0_i32_0 = arith.constant 0 : i32
    return %arg0, %arg2, %c0_i32 : i32, i32, i32
  }
  func.func @transform_1(%arg0: i32, %arg1: i32, %arg2: i32) -> (i32, i32) {
    %c0_i32 = arith.constant 0 : i32
    %c0_i32_0 = arith.constant 0 : i32
    return %c0_i32, %arg1 : i32, i32
  }
  func.func @transform_2(%arg0: i32, %arg1: i32, %arg2: i32) -> (i32, i32) {
    %c0_i32 = arith.constant 0 : i32
    %c0_i32_0 = arith.constant 0 : i32
    return %c0_i32, %arg1 : i32, i32
  }
  func.func @transform_3(%arg0: i32, %arg1: i32, %arg2: i32) -> (i32, i32) {
    %c0_i32 = arith.constant 0 : i32
    %c0_i32_0 = arith.constant 0 : i32
    return %c0_i32, %arg1 : i32, i32
  }
  func.func @transform_4(%arg0: i32, %arg1: i32, %arg2: i32) -> (i32, i32) {
    %c0_i32 = arith.constant 0 : i32
    %c0_i32_0 = arith.constant 0 : i32
    return %arg2, %c0_i32 : i32, i32
  }
  func.func @transform_5(%arg0: i32, %arg1: i32, %arg2: i32) -> (i32, i32) {
    %c0_i32 = arith.constant 0 : i32
    %c0_i32_0 = arith.constant 0 : i32
    return %arg2, %c0_i32 : i32, i32
  }
  func.func @transform_6(%arg0: i32, %arg1: i32, %arg2: i32) -> (i32, i32) {
    %c0_i32 = arith.constant 0 : i32
    %c0_i32_0 = arith.constant 0 : i32
    return %arg2, %c0_i32 : i32, i32
  }
  func.func @transform_7(%arg0: i32, %arg1: i32, %arg2: i32) -> (i32, i32) {
    %c0_i32 = arith.constant 0 : i32
    %c0_i32_0 = arith.constant 0 : i32
    return %arg2, %c0_i32 : i32, i32
  }
  func.func @transform_8(%arg0: i32, %arg1: i32, %arg2: i32) -> (i32, i32, i32) {
    %c0_i32 = arith.constant 0 : i32
    return %arg0, %arg2, %arg1 : i32, i32, i32
  }
  func.func @transform_9(%arg0: i32, %arg1: i32, %arg2: i32) -> (i32, i32, i32) {
    %c0_i32 = arith.constant 0 : i32
    return %arg0, %arg2, %arg1 : i32, i32, i32
  }
  func.func @transform_10(%arg0: i32, %arg1: i32, %arg2: i32) -> (i32, i32, i32) {
    %c0_i32 = arith.constant 0 : i32
    return %arg0, %arg2, %arg1 : i32, i32, i32
  }
}

</mosaic_0001>

<bundles_post_ra>
// kernel: tpu_custom_call.1
= control target key start
LH: loop header
LB: loop body
LE: loop exit
PB: predicated region body
PF: predicated region fallthrough
CT: control target
= control target key end

     0   :  { %s4964_s0 = inlined_call_operand.hbm [shape: bf16[2,256,256], index: 0, kind: input, shape index: {}]   ;;  %s4965_s1 = inlined_call_operand.hbm [shape: bf16[256,256], index: 1, kind: input, shape index: {}]   ;;  %s4966_s2 = inlined_call_operand.hbm [shape: bf16[256,256], index: 2, kind: input, shape index: {}]   ;;  %s4967_s3 = inlined_call_operand.hbm [shape: bf16[256,256], index: 3, kind: input, shape index: {}]   ;;  %s4968_s4 = inlined_call_operand.hbm [shape: f32[256,128], index: 4, kind: input, shape index: {}]   ;;  %s4969_s5 = inlined_call_operand.hbm [shape: f32[256,128], index: 5, kind: input, shape index: {}]   ;;  %s4970_s6 = inlined_call_operand.hbm [shape: f32[256,128], index: 6, kind: input, shape index: {}]   ;;  %s4971_s7 = inlined_call_operand.hbm [shape: f32[256,128], index: 7, kind: input, shape index: {}]   ;;  %s4972_s8 = inlined_call_operand.hbm [shape: bf16[2,256,256], index: 8, kind: output, shape index: {0}]   ;;  %s4973_s9 = inlined_call_operand.hbm [shape: bf16[2,256,256], index: 9, kind: output, shape index: {1}]   ;;  %s4974_s10 = inlined_call_operand.hbm [shape: bf16[2,256,256], index: 10, kind: output, shape index: {2}]  }
   0x1   :  { %5041 = sst [smem:[#allocation53_spill]] %s4964_s0 }
   0x2   :  { %5042 = sst [smem:[#allocation54_spill]] %s4965_s1 }
   0x3   :  { %5043 = sst [smem:[#allocation55_spill]] %s4966_s2 }
   0x4   :  { %5044 = sst [smem:[#allocation56_spill]] %s4967_s3 }
   0x5   :  { %5045 = sst [smem:[#allocation57_spill]] %s4968_s4 }
   0x6   :  { %5046 = sst [smem:[#allocation58_spill]] %s4969_s5 }
   0x7   :  { %5047 = sst [smem:[#allocation59_spill]] %s4970_s6 }
   0x8   :  { %5048 = sst [smem:[#allocation60_spill]] %s4971_s7 }
   0x9   :  { %5049 = sst [smem:[#allocation61_spill]] %s4972_s8 }
   0xa   :  { %5050 = sst [smem:[#allocation62_spill]] %s4973_s9 }
   0xb   :  { %5051 = sst [smem:[#allocation63_spill]] %s4974_s10 }
   0xc   :  { %16 = vsyncpa [#allocation3], 0 }
   0xd   :  { %18 = vsyncpa [#allocation3 + $0x1], 0 }
   0xe   :  { %19 = vsyncpa [#allocation6], 0 }
   0xf   :  { %21 = vsyncpa [#allocation6 + $0x1], 0 }
  0x10   :  { %22 = vsyncpa [#allocation9], 0 }
  0x11   :  { %24 = vsyncpa [#allocation9 + $0x1], 0 }
  0x12   :  { %25 = vsyncpa [#allocation12], 0 }
  0x13   :  { %27 = vsyncpa [#allocation12 + $0x1], 0 }
  0x14   :  { %28 = vsyncpa [#allocation15], 0 }
  0x15   :  { %30 = vsyncpa [#allocation15 + $0x1], 0 }
  0x16   :  { %31 = vsyncpa [#allocation4], 0 }
  0x17   :  { %33 = vsyncpa [#allocation4 + $0x1], 0 }
  0x18   :  { %34 = vsyncpa [#allocation18], 0 }
  0x19   :  { %36 = vsyncpa [#allocation18 + $0x1], 0  ;;  %s3774_s13 = smov 0   ;;  %s3776_s14 = smov 0  }
  0x1a   :  { %s3778_s15 = smov 0   ;;  %s3780_s16 = smov 0  }
  0x1b   :  { %s3782_s17 = smov 0   ;;  %s3784_s18 = smov 0  }
  0x1c   :  { %s3786_s19 = smov 0   ;;  %s3788_s20 = smov 0  }
  0x1d   :  { %s3790_s21 = smov 0   ;;  %s3792_s22 = smov 0  }
  0x1e   :  { %s3794_s23 = smov 0   ;;  %s3796_s24 = smov 0  }
  0x1f   :  { %s3798_s25 = smov 0   ;;  %s3800_s26 = smov 0  }
  0x20   :  { %s3802_s27 = smov 0   ;;  %s3804_s28 = smov 0  }
  0x21   :  { %s3806_s29 = smov 0   ;;  %s3808_s30 = smov 0  }
  0x22   :  { %s3810_s11 = smov 0  }
  0x23 LB: > { %5052 = sst [smem:[#allocation28_spill]] %s3627_s13  ;;  %p4986_p0 = scmp.eq.s32.totalorder %s3699_s11, 0  ;;  %s3699_s11 = sphi %s3810_s11, %s42_s11   ;;  %s3695_s30 = sphi %s3808_s30, %s5181_s30   ;;  %s3691_s29 = sphi %s3806_s29, %s5171_s29   ;;  %s3687_s28 = sphi %s3804_s28, %s5180_s28   ;;  %s3683_s27 = sphi %s3802_s27, %s5179_s27   ;;  %s3679_s26 = sphi %s3800_s26, %s5169_s26   ;;  %s3675_s25 = sphi %s3798_s25, %s5178_s25   ;;  %s3671_s24 = sphi %s3796_s24, %s5177_s24   ;;  %s3667_s23 = sphi %s3794_s23, %s5176_s23   ;;  %s3663_s22 = sphi %s3792_s22, %s5175_s22   ;;  %s3659_s21 = sphi %s3790_s21, %s5167_s21   ;;  %s3655_s20 = sphi %s3788_s20, %s5166_s20   ;;  %s3651_s19 = sphi %s3786_s19, %s5165_s19   ;;  %s3647_s18 = sphi %s3784_s18, %s5174_s18   ;;  %s3643_s17 = sphi %s3782_s17, %s5173_s17   ;;  %s3639_s16 = sphi %s3780_s16, %s5163_s16   ;;  %s3635_s15 = sphi %s3778_s15, %s5195_s15   ;;  %s3631_s14 = sphi %s3776_s14, %s5162_s14   ;;  %s3627_s13 = sphi %s3774_s13, %s5161_s13  }
  0x24   : > { %5053 = sst [smem:[#allocation29_spill]] %s3631_s14  ;;  %p103_p1 = scmp.ne.s32.totalorder %s3659_s21, %s3655_s20 }
  0x25   : > { %5054 = sst [smem:[#allocation30_spill]] %s3635_s15  ;;  %p4985_p4 = scmp.lt.s32.totalorder %s3699_s11, 8 }
  0x26   : > { %5055 = sst [smem:[#allocation31_spill]] %s3643_s17  ;;  %p105_p3 = por %p103_p1, %p4986_p0 }
  0x27   : > { %5056 = sst [smem:[#allocation32_spill]] %s3655_s20  ;;  %s3880_s10 = sand.u32 1, %s3699_s11  }
  0x28   : > { %5057 = sst [smem:[#allocation33_spill]] %s3659_s21  ;;  %s405_s9 = sand.u32 1, %s3659_s21  }
  0x29   : > { %5058 = sst [smem:[#allocation34_spill]] %s3675_s25  ;;  %s5062_s1 = sld [smem:[#allocation54_spill]] }
  0x2a   : > { %5059 = sst [smem:[#allocation35_spill]] %s3679_s26  ;;  %s3886_s26 = sshll.u32 %s3691_s29, 6 }
  0x2b   : > { %5060 = sst [smem:[#allocation36_spill]] %s3683_s27  ;;  %s3883_s27 = sshll.u32 %s405_s9, 7 }
  0x2c   : > { %5061 = sst [smem:[#allocation37_spill]] %s3691_s29  ;;  %s407_s8 = scalar_lea.vmem [#allocation5], %s3883_s27 }
  0x2d   : > { %s413_s6 = sshll.u32 %s407_s8, 4  ;;  %p3897_p5 = pnand %p4985_p4, %p105_p3  ;;  %s3901_s6 = int_to_ptr.vmem [resolvable:$true] %s413_s6 }
  0x2f   : > { %s3892_s12 = scalar_lea.hbm %s5062_s1, %s3886_s26  ;;  %p3908_p7 = pneg %p3897_p5 }
  0x30   : > { %s5063_s4 = scalar_select %p3897_p5, 1, 0 }
  0x31   : > { %s3193_s2 = scalar_lea.hbm %s3892_s12, 2048  ;;  %s3198_s0 = scalar_lea.hbm %s5062_s1, 4096 }
  0x32   : > { %p3194_p6 = scmp.ne.s32.totalorder %s3892_s12, %s3193_s2  ;;  %p3199_p10 = scmp.lt.u32.totalorder %s3892_s12, %s5062_s1 }
  0x33   : > { %s5064_s7 = scalar_select %p3908_p7, 1, 0 }
  0x34   : > { %p3196_p8 = pnand %p3908_p7, %p3194_p6  ;;  %p3200_p11 = scmp.lt.u32.totalorder %s3198_s0, %s3193_s2 }
  0x35   : > { %p3202_p13 = scmp.lt.u32.totalorder %s3193_s2, %s3892_s12 }
  0x36   : > { %p3197_p9 = pneg %p3196_p8  ;;  %p3201_p12 = por %p3200_p11, %p3199_p10 }
  0x38   : > { %p3203_p1 = por %p3202_p13, %p3201_p12 }
  0x3a   : > { %p3204_p3 = pnand %p3203_p1, %p3197_p9 }
  0x3c   : > { %3207 = shalt.err (!%p3204_p3)
}
  0x3d   : > { %s3208_s9 = scalar_lea.vmem %s3901_s6, 2048  ;;  %s3701_s8 = smov [#allocation5]  }
  0x3e   : > { %p3209_p6 = scmp.ne.s32.totalorder %s3901_s6, %s3208_s9  ;;  %s3213_s25 = sshll.u32 %s3701_s8, 4  ;;  %s3214_s25 = int_to_ptr.vmem [resolvable:$false] %s3213_s25 }
  0x3f   : > { %s3215_s13 = scalar_lea.vmem %s3214_s25, 4096  ;;  %p3216_p0 = scmp.lt.s32.totalorder %s3901_s6, %s3214_s25 }
  0x40   : > { %p3211_p8 = pnand %p3209_p6, %p3908_p7  ;;  %p3217_p2 = scmp.lt.s32.totalorder %s3215_s13, %s3208_s9 }
  0x42   : > { %p3212_p4 = pneg %p3211_p8  ;;  %p3218_p10 = por %p3217_p2, %p3216_p0 }
  0x44   : > { %p3219_p11 = pnand %p3218_p10, %p3212_p4 }
  0x46   : > { %3222 = shalt.err (!%p3219_p11)
}
  0x47   : > { %s4990_s0 = smov 128   ;;  %s4992_s2 = smov 64  }
  0x48   : > { %s4995_s14 = smov 4   ;;  %s5065_s9 = scalar_lea.sflag [#allocation6], %s3880_s10 }
  0x49   : > { %2931 = dma.hbm_to_vmem [thread:$0]  (!%p3897_p5), %s3892_s12, 2048, %s3901_s6, %s5065_s9, %s4990_s0, %s4992_s2, %s4995_s14  }
  0x4a   : > { %p2357_p0 = scmp.ge.s32.totalorder %s3699_s11, 1  ;;  %p545_p2 = scmp.lt.s32.totalorder %s3699_s11, 9 }
  0x4b   : > { %s5068_s3 = sld [smem:[#allocation56_spill]]  ;;  %s447_s21 = scalar_lea.vmem [#allocation8], %s3883_s27 }
  0x4c   : > { %p3938_p4 = pnand %p2357_p0, %p545_p2  ;;  %s453_s15 = sshll.u32 %s447_s21, 4  ;;  %s3949_s15 = int_to_ptr.vmem [resolvable:$true] %s453_s15 }
  0x4d   : > { %s4994_s6 = scalar_lea.sflag [#allocation9], %s3880_s10 }
  0x4e   : > { %s5066_s8 = scalar_select %p3938_p4, 1, 0 }
  0x50   : > { %5067 = sst [smem:[#allocation38_spill]] %s5066_s8 }
  0x51   : > { %s3946_s1 = scalar_lea.hbm %s5068_s3, %s3886_s26  ;;  %s3228_s25 = scalar_lea.hbm %s5068_s3, 4096 }
  0x52   : > { %s3223_s12 = scalar_lea.hbm %s3946_s1, 2048  ;;  %p3229_p1 = scmp.lt.u32.totalorder %s3946_s1, %s5068_s3 }
  0x53   : > { %p3224_p9 = scmp.ne.s32.totalorder %s3946_s1, %s3223_s12  ;;  %p3230_p3 = scmp.lt.u32.totalorder %s3228_s25, %s3223_s12 }
  0x54   : > { %p3232_p8 = scmp.lt.u32.totalorder %s3223_s12, %s3946_s1 }
  0x55   : > { %p3226_p12 = pnand %p3224_p9, %p3908_p7  ;;  %p3231_p6 = por %p3230_p3, %p3229_p1 }
  0x57   : > { %p3227_p13 = pneg %p3226_p12  ;;  %p3233_p10 = por %p3232_p8, %p3231_p6 }
  0x59   : > { %p3234_p11 = pnand %p3233_p10, %p3227_p13 }
  0x5b   : > { %3237 = shalt.err (!%p3234_p11)
}
  0x5c   : > { %s3238_s21 = scalar_lea.vmem %s3949_s15, 2048  ;;  %s3705_s0 = smov [#allocation8]  }
  0x5d   : > { %p3239_p0 = scmp.ne.s32.totalorder %s3949_s15, %s3238_s21  ;;  %s3243_s9 = sshll.u32 %s3705_s0, 4  ;;  %s3244_s9 = int_to_ptr.vmem [resolvable:$false] %s3243_s9 }
  0x5e   : > { %s3245_s2 = scalar_lea.vmem %s3244_s9, 4096  ;;  %p3246_p12 = scmp.lt.s32.totalorder %s3949_s15, %s3244_s9 }
  0x5f   : > { %p3241_p2 = pnand %p3239_p0, %p3908_p7  ;;  %p3247_p4 = scmp.lt.s32.totalorder %s3245_s2, %s3238_s21 }
  0x61   : > { %p3242_p9 = pneg %p3241_p2  ;;  %p3248_p1 = por %p3247_p4, %p3246_p12 }
  0x63   : > { %p3249_p3 = pnand %p3248_p1, %p3242_p9 }
  0x65   : > { %3252 = shalt.err (!%p3249_p3)
}
  0x66   : > { %s5069_s12 = smov 64   ;;  %s5070_s25 = smov 128  }
  0x67   : > { %2937 = dma.hbm_to_vmem [thread:$0]  (!%p3897_p5), %s3946_s1, 2048, %s3949_s15, %s4994_s6, %s5070_s25, %s5069_s12, %s4995_s14  }
  0x68   : > { %s3979_s13 = sadd.s32 4294967295, %s3699_s11   ;;  %s54_s21 = sadd.s32 1, %s3687_s28 }
  0x69   : > { %p3982_p4 = scmp.ge.s32.totalorder %s54_s21, 2  ;;  %p5006_p13 = scmp.eq.s32.totalorder %s3979_s13, 0 }
  0x6a   : > { %p181_p6 = scmp.ne.s32.totalorder %s3647_s18, %s3643_s17  ;;  %p5073_p8 = scmp.ne.s32.totalorder %s3655_s20, %s3651_s19 }
  0x6b   : > { %s5071_s0 = scalar_select %p3982_p4, 1, 0 }
  0x6c   : > { %s5183_s21 = smov (%p3982_p4, %s54_s21), 0  ;;  %p3999_p10 = por %p5073_p8, %p5006_p13 }
  0x6d   : > { %5072 = sst [smem:[#allocation39_spill]] %s5183_s21  ;;  %p5076_p11 = scmp.eq.s32.totalorder %s3699_s11, 0 }
  0x6e   : > { %s5074_s1 = scalar_select %p3999_p10, 1, 0 }
  0x6f   : > { %p183_p0 = por %p181_p6, %p5076_p11  ;;  %p187_p2 = scmp.ne.s32.totalorder %s3643_s17, %s3639_s16 }
  0x70   : > { %5075 = sst [smem:[#allocation40_spill]] %s5074_s1  ;;  %s4996_s15 = sand.u32 1, %s3647_s18  }
  0x71   : > { %p4011_p12 = por %p187_p2, %p5006_p13  ;;  %s4017_s6 = sshll.u32 %s4996_s15, 7 }
  0x72   : > { %5079 = sst [smem:[#allocation42_spill]] %s4017_s6  ;;  %s4020_s14 = sshll.u32 %s3687_s28, 11 }
  0x73   : > { %s5077_s2 = scalar_select %p4011_p12, 1, 0 }
  0x74   : > { %5080 = sst [smem:[#allocation43_spill]] %s4020_s14  ;;  %p5081_p1 = scmp.lt.s32.totalorder %s3699_s11, 8 }
  0x75   : > { %5078 = sst [smem:[#allocation41_spill]] %s5077_s2  ;;  %s488_s15 = scalar_lea.vmem [#allocation11], %s4017_s6 }
  0x76   : > { %p4024_p3 = pnand %p5081_p1, %p183_p0  ;;  %s5084_s5 = sld [smem:[#allocation58_spill]] }
  0x77   : > { %s495_s2 = sshll.u32 %s488_s15, 4  ;;  %s4035_s2 = int_to_ptr.vmem [resolvable:$true] %s495_s2 }
  0x78   : > { %s5082_s19 = scalar_select %p4024_p3, 1, 0 }
  0x79   : > { %p4042_p8 = pneg %p4024_p3 }
  0x7a   : > { %5083 = sst [smem:[#allocation44_spill]] %s5082_s19 }
  0x7b   : > { %s5085_s20 = scalar_select %p4042_p8, 1, 0 }
  0x7c   : > { %s4032_s3 = scalar_lea.hbm %s5084_s5, %s4020_s14  ;;  %s3258_s8 = scalar_lea.hbm %s5084_s5, 4096 }
  0x7d   : > { %s3253_s1 = scalar_lea.hbm %s4032_s3, 2048  ;;  %5086 = sst [smem:[#allocation45_spill]] %s5085_s20 }
  0x7e   : > { %p3254_p6 = scmp.ne.s32.totalorder %s4032_s3, %s3253_s1  ;;  %p3259_p2 = scmp.lt.u32.totalorder %s4032_s3, %s5084_s5 }
  0x7f   : > { %p3260_p1 = scmp.lt.u32.totalorder %s3258_s8, %s3253_s1  ;;  %p3262_p13 = scmp.lt.u32.totalorder %s3253_s1, %s4032_s3 }
  0x80   : > { %p3256_p11 = pnand %p4042_p8, %p3254_p6 }
  0x81   : > { %p3261_p9 = por %p3260_p1, %p3259_p2 }
  0x82   : > { %p3257_p0 = pneg %p3256_p11 }
  0x83   : > { %p3263_p12 = por %p3262_p13, %p3261_p9 }
  0x85   : > { %p3264_p10 = pnand %p3263_p12, %p3257_p0 }
  0x87   : > { %3267 = shalt.err (!%p3264_p10)
}
  0x88   : > { %s3268_s17 = scalar_lea.vmem %s4035_s2, 2048  ;;  %s3706_s9 = smov [#allocation11]  }
  0x89   : > { %p3269_p6 = scmp.ne.s32.totalorder %s4035_s2, %s3268_s17  ;;  %s3273_s16 = sshll.u32 %s3706_s9, 4  ;;  %s3274_s16 = int_to_ptr.vmem [resolvable:$false] %s3273_s16 }
  0x8a   : > { %s3275_s6 = scalar_lea.vmem %s3274_s16, 4096  ;;  %p3276_p7 = scmp.lt.s32.totalorder %s4035_s2, %s3274_s16 }
  0x8b   : > { %p3271_p11 = pnand %p3269_p6, %p4042_p8  ;;  %p3277_p4 = scmp.lt.s32.totalorder %s3275_s6, %s3268_s17 }
  0x8d   : > { %p3272_p5 = pneg %p3271_p11  ;;  %p3278_p2 = por %p3277_p4, %p3276_p7 }
  0x8f   : > { %p3279_p1 = pnand %p3278_p2, %p3272_p5 }
  0x91   : > { %3282 = shalt.err (!%p3279_p1)
}
  0x92   : > { %s5019_s8 = smov 8   ;;  %s5087_s1 = scalar_lea.sflag [#allocation12], %s3880_s10 }
  0x93   : > { %2943 = dma.hbm_to_vmem [thread:$0]  (!%p4024_p3), %s4032_s3, 2048, %s4035_s2, %s5087_s1, %s5070_s25, %s5070_s25, %s5019_s8  }
  0x94   : > { %s5088_s15 = sld [smem:[#allocation30_spill]]  ;;  %s61_s9 = sadd.s32 1, %s3695_s30 }
  0x95   : > { %s5089_s16 = sadd.s32 1, %s3691_s29  ;;  %p5090_p5 = scmp.ne.s32.totalorder %s5071_s0, 0 }
  0x96   : > { %s5091_s6 = sld [smem:[#allocation33_spill]]  ;;  %s66_s5 = ssub.s32 %s3687_s28, %s5183_s21 }
  0x97   : > { %s5185_s16 = smov (!%p5090_p5, %s5089_s16), %s3691_s29  ;;  %s70_s19 = sadd.s32 1, %s3671_s24 }
  0x98   : > { %s5092_s20 = sld [smem:[#allocation29_spill]]  ;;  %p59_p7 = scmp.ge.s32.totalorder %s5185_s16, 2 }
  0x99   : > { %p77_p4 = scmp.ne.s32.totalorder %s3671_s24, %s3667_s23  ;;  %s5093_s14 = sld [smem:[#allocation28_spill]] }
  0x9a   : > { %p83_p13 = scmp.ne.s32.totalorder %s3667_s23, %s3663_s22  ;;  %p172_p10 = scmp.eq.s32.totalorder %s66_s5, 0 }
  0x9b   : > { %s5187_s16 = smov (%p59_p7, %s5185_s16), 0  ;;  %s5189_s9 = smov (!%p59_p7, %s61_s9), %s3695_s30 }
  0x9c   : > { %5094 = sst [smem:[#allocation46_spill]] %s5187_s16  ;;  %p5095_p9 = scmp.eq.s32.totalorder %s3699_s11, 0 }
  0x9d   : > { %p5097_p0 = scmp.eq.s32.totalorder %s3979_s13, 0  ;;  %p63_p11 = scmp.ge.s32.totalorder %s5189_s9, 2 }
  0x9e   : > { %p4089_p12 = por %p5095_p9, %p77_p4  ;;  %s93_s22 = ssub.s32 %s3691_s29, %s5187_s16 }
  0x9f   : > { %p4095_p6 = por %p5097_p0, %p83_p13  ;;  %p94_p2 = scmp.eq.s32.totalorder %s93_s22, 0 }
  0xa0   : > { %s282_s2 = sadd.s32 1, %s5088_s15  ;;  %s5191_s9 = smov (%p63_p11, %s5189_s9), 0 }
  0xa1   : > { %s5098_s0 = scalar_select %p4095_p6, 1, 0 }
  0xa2   : > { %5100 = sst [smem:[#allocation48_spill]] %s5191_s9  ;;  %s5101_s1 = sadd.s32 1, %s5091_s6 }
  0xa3   : > { %5099 = sst [smem:[#allocation47_spill]] %s5098_s0  ;;  %s5193_s6 = smov (!%p94_p2, %s5091_s6), %s5101_s1 }
  0xa4   : > { %5102 = sst [smem:[#allocation49_spill]] %s5193_s6  ;;  %s65_s8 = ssub.s32 %s3695_s30, %s5191_s9 }
  0xa5   : > { %p292_p1 = scmp.ne.s32.totalorder %s5088_s15, %s5092_s20  ;;  %s67_s17 = sor.u32 %s66_s5, %s65_s8 }
  0xa6   : > { %p298_p5 = scmp.ne.s32.totalorder %s5092_s20, %s5093_s14  ;;  %p68_p7 = scmp.eq.s32.totalorder %s67_s17, 0 }
  0xa7   : > { %s279_s21 = sor.u32 %s93_s22, %s67_s17  ;;  %s5103_s0 = sadd.s32 1, %s3647_s18 }
  0xa8   : > { %s4119_s16 = scalar_select %p172_p10, %s3647_s18, %s5103_s0  }
  0xa9   : > { %s4122_s29 = scalar_select %p68_p7, %s3671_s24, %s70_s19  }
  0xaa   : > { %5104 = sst [smem:[#allocation50_spill]] %s4119_s16  ;;  %p280_p4 = scmp.eq.s32.totalorder %s279_s21, 0 }
  0xab   : > { %5105 = sst [smem:[#allocation51_spill]] %s4122_s29  ;;  %p5106_p13 = scmp.eq.s32.totalorder %s3979_s13, 7 }
  0xac   : > { %s5109_s9 = sadd.s32 4294967294, %s3699_s11   ;;  %s379_s20 = sand.u32 1, %s3671_s24  }
  0xad   : > { %p4126_p9 = por %p5106_p13, %p292_p1  ;;  %p299_p0 = scmp.eq.s32.totalorder %s5109_s9, 7 }
  0xae   : > { %s5195_s15 = smov (!%p280_p4, %s5088_s15), %s282_s2  ;;  %s2334_s14 = sshll.u32 %s379_s20, 7 }
  0xaf   : > { %s5107_s1 = scalar_select %p4126_p9, 1, 0 }
  0xb0   : > { %p4136_p11 = por %p299_p0, %p298_p5  ;;  %s2498_s19 = sshll.u32 %s3687_s28, 5 }
  0xb1   : > { %5108 = sst [smem:[#allocation52_spill]] %s5107_s1  ;;  %s2337_s8 = sshll.u32 %s3695_s30, 6 }
  0xb2   : > { %s5110_s5 = scalar_select %p4136_p11, 1, 0 }
  0xb3   : > { %s390_s21 = sadd.s32 %s2498_s19, %s2337_s8  ;;  %s383_s17 = scalar_lea.vmem [#allocation2], %s2334_s14 }
  0xb4   : > { %s393_s0 = sshll.u32 %s383_s17, 4  ;;  %s2338_s22 = sshll.u32 %s390_s21, 6  ;;  %s4142_s0 = int_to_ptr.vmem [resolvable:$true] %s393_s0 }
  0xb5   : > { %s5111_s16 = sld [smem:[#allocation53_spill]]  ;;  %p5113_p10 = scmp.lt.s32.totalorder %s3699_s11, 8 }
  0xb6   : > { %s5115_s8 = sld [smem:[#allocation55_spill]]  ;;  %s427_s29 = scalar_lea.vmem [#allocation7], %s3883_s27 }
  0xb7   : > { %p4153_p2 = pnand %p5113_p10, %p4089_p12  ;;  %s4166_s6 = scalar_lea.sflag [#allocation3], %s379_s20 }
  0xb9   : > { %p3285_p5 = pneg %p4153_p2 }
  0xbb   : > { %s5112_s1 = smov %s5111_s16  ;;  %s4147_s9 = scalar_lea.hbm %s5111_s16, %s2338_s22 }
  0xbc   : > { %s4161_s21 = scalar_lea.hbm %s5115_s8, %s3886_s26  ;;  %s4164_s16 = sshll.u32 %s427_s29, 4  ;;  %s4198_s16 = int_to_ptr.vmem [resolvable:$true] %s4164_s16 }
  0xbd   : > { %s3283_s3 = scalar_lea.hbm %s4147_s9, 2048  ;;  %s3288_s14 = scalar_lea.hbm %s5112_s1, 8192 }
  0xbe   : > { %p3284_p1 = scmp.ne.s32.totalorder %s4147_s9, %s3283_s3  ;;  %p3289_p4 = scmp.lt.u32.totalorder %s4147_s9, %s5112_s1 }
  0xbf   : > { %p3290_p13 = scmp.lt.u32.totalorder %s3288_s14, %s3283_s3  ;;  %p3292_p10 = scmp.lt.u32.totalorder %s3283_s3, %s4147_s9 }
  0xc0   : > { %p3286_p12 = pnand %p3285_p5, %p3284_p1 }
  0xc1   : > { %p3291_p0 = por %p3290_p13, %p3289_p4 }
  0xc2   : > { %p3287_p7 = pneg %p3286_p12 }
  0xc3   : > { %p3293_p11 = por %p3292_p10, %p3291_p0 }
  0xc5   : > { %p3294_p9 = pnand %p3293_p11, %p3287_p7 }
  0xc7   : > { %3297 = shalt.err (!%p3294_p9)
}
  0xc8   : > { %s3298_s27 = scalar_lea.vmem %s4142_s0, 2048  ;;  %s3708_s20 = smov [#allocation2]  }
  0xc9   : > { %p3299_p1 = scmp.ne.s32.totalorder %s4142_s0, %s3298_s27  ;;  %s3303_s29 = sshll.u32 %s3708_s20, 4  ;;  %s3304_s29 = int_to_ptr.vmem [resolvable:$false] %s3303_s29 }
  0xca   : > { %s3305_s17 = scalar_lea.vmem %s3304_s29, 4096  ;;  %p3306_p3 = scmp.lt.s32.totalorder %s4142_s0, %s3304_s29 }
  0xcb   : > { %p3301_p12 = pnand %p3299_p1, %p3285_p5  ;;  %p3307_p4 = scmp.lt.s32.totalorder %s3305_s17, %s3298_s27 }
  0xcd   : > { %p3302_p6 = pneg %p3301_p12  ;;  %p3308_p13 = por %p3307_p4, %p3306_p3 }
  0xcf   : > { %p3309_p0 = pnand %p3308_p13, %p3302_p6 }
  0xd1   : > { %3312 = shalt.err (!%p3309_p0)
}
  0xd2   : > { %s5116_s3 = smov 8   ;;  %s3313_s22 = scalar_lea.hbm %s4161_s21, 2048 }
  0xd3   : > { %2928 = dma.hbm_to_vmem [thread:$0]  (!%p4153_p2), %s4147_s9, 2048, %s4142_s0, %s4166_s6, %s5070_s25, %s5070_s25, %s5116_s3  }
  0xd4   : > { %p3314_p3 = scmp.ne.s32.totalorder %s4161_s21, %s3313_s22  ;;  %p5117_p6 = scmp.ne.s32.totalorder %s5064_s7, 0 }
  0xd5   : > { %s3318_s19 = scalar_lea.hbm %s5115_s8, 4096  ;;  %p3319_p5 = scmp.lt.u32.totalorder %s4161_s21, %s5115_s8 }
  0xd6   : > { %p3316_p9 = pnand %p3314_p3, %p5117_p6  ;;  %p3320_p7 = scmp.lt.u32.totalorder %s3318_s19, %s3313_s22 }
  0xd7   : > { %p3322_p1 = scmp.lt.u32.totalorder %s3313_s22, %s4161_s21 }
  0xd8   : > { %p3317_p11 = pneg %p3316_p9  ;;  %p3321_p10 = por %p3320_p7, %p3319_p5 }
  0xda   : > { %p3323_p12 = por %p3322_p1, %p3321_p10 }
  0xdc   : > { %p3324_p2 = pnand %p3323_p12, %p3317_p11 }
  0xde   : > { %3327 = shalt.err (!%p3324_p2)
}
  0xdf   : > { %s3328_s0 = scalar_lea.vmem %s4198_s16, 2048  ;;  %s3709_s9 = smov [#allocation7]  }
  0xe0   : > { %p3329_p4 = scmp.ne.s32.totalorder %s4198_s16, %s3328_s0  ;;  %s3333_s6 = sshll.u32 %s3709_s9, 4  ;;  %s3334_s6 = int_to_ptr.vmem [resolvable:$false] %s3333_s6 }
  0xe1   : > { %s3335_s20 = scalar_lea.vmem %s3334_s6, 4096  ;;  %p3336_p3 = scmp.lt.s32.totalorder %s4198_s16, %s3334_s6 }
  0xe2   : > { %p3331_p13 = pnand %p3329_p4, %p5117_p6  ;;  %p3337_p9 = scmp.lt.s32.totalorder %s3335_s20, %s3328_s0 }
  0xe4   : > { %p3332_p0 = pneg %p3331_p13  ;;  %p3338_p5 = por %p3337_p9, %p3336_p3 }
  0xe6   : > { %p3339_p7 = pnand %p3338_p5, %p3332_p0 }
  0xe8   : > { %3342 = shalt.err (!%p3339_p7)
}
  0xe9   : > { %p5118_p11 = scmp.ne.s32.totalorder %s5063_s4, 0  ;;  %s5119_s29 = smov 4  }
  0xea   : > { %s5120_s17 = scalar_lea.sflag [#allocation6], %s3880_s10  ;;  %s5121_s7 = sld [smem:[#allocation43_spill]] }
  0xeb   : > { %s5122_s22 = sld [smem:[#allocation42_spill]]  ;;  %s5124_s26 = sld [smem:[#allocation57_spill]] }
  0xec   : > { %2934 = dma.hbm_to_vmem [thread:$0]  (!%p5118_p11), %s4161_s21, 2048, %s4198_s16, %s5120_s17, %s5070_s25, %s5069_s12, %s5119_s29  }
  0xf1   : > { %s5125_s9 = smov %s5124_s26  ;;  %s4230_s27 = scalar_lea.hbm %s5124_s26, %s5121_s7 }
  0xf2   : > { %s467_s4 = scalar_lea.vmem [#allocation10], %s5122_s22  ;;  %s3343_s6 = scalar_lea.hbm %s4230_s27, 2048 }
  0xf3   : > { %s474_s0 = sshll.u32 %s467_s4, 4  ;;  %p3344_p6 = scmp.ne.s32.totalorder %s4230_s27, %s3343_s6  ;;  %s4233_s0 = int_to_ptr.vmem [resolvable:$true] %s474_s0 }
  0xf4   : > { %s3348_s21 = scalar_lea.hbm %s5125_s9, 4096  ;;  %p3349_p12 = scmp.lt.u32.totalorder %s4230_s27, %s5125_s9 }
  0xf5   : > { %p3346_p10 = pnand %p3344_p6, %p4042_p8  ;;  %p3350_p2 = scmp.lt.u32.totalorder %s3348_s21, %s3343_s6 }
  0xf6   : > { %p3352_p13 = scmp.lt.u32.totalorder %s3343_s6, %s4230_s27 }
  0xf7   : > { %p3347_p1 = pneg %p3346_p10  ;;  %p3351_p4 = por %p3350_p2, %p3349_p12 }
  0xf9   : > { %p3353_p0 = por %p3352_p13, %p3351_p4 }
  0xfb   : > { %p3354_p3 = pnand %p3353_p0, %p3347_p1 }
  0xfd   : > { %3357 = shalt.err (!%p3354_p3)
}
  0xfe   : > { %s3358_s17 = scalar_lea.vmem %s4233_s0, 2048  ;;  %s3710_s14 = smov [#allocation10]  }
  0xff   : > { %p3359_p9 = scmp.ne.s32.totalorder %s4233_s0, %s3358_s17  ;;  %s3363_s19 = sshll.u32 %s3710_s14, 4  ;;  %s3364_s19 = int_to_ptr.vmem [resolvable:$false] %s3363_s19 }
 0x100   : > { %s3365_s26 = scalar_lea.vmem %s3364_s19, 4096  ;;  %p3366_p11 = scmp.lt.s32.totalorder %s4233_s0, %s3364_s19 }
 0x101   : > { %p3361_p5 = pnand %p3359_p9, %p4042_p8  ;;  %p3367_p6 = scmp.lt.s32.totalorder %s3365_s26, %s3358_s17 }
 0x103   : > { %p3362_p7 = pneg %p3361_p5  ;;  %p3368_p10 = por %p3367_p6, %p3366_p11 }
 0x105   : > { %p3369_p12 = pnand %p3368_p10, %p3362_p7 }
 0x107   : > { %3372 = shalt.err (!%p3369_p12)
}
 0x108   : > { %s5126_s4 = sld [smem:[#allocation44_spill]]  ;;  %s5128_s6 = scalar_lea.sflag [#allocation9], %s3880_s10 }
 0x109   : > { %s5129_s21 = sld [smem:[#allocation59_spill]]  ;;  %s509_s29 = scalar_lea.vmem [#allocation13], %s5122_s22 }
 0x10a   : > { %s516_s17 = sshll.u32 %s509_s29, 4  ;;  %s4268_s17 = int_to_ptr.vmem [resolvable:$true] %s516_s17 }
 0x10e   : > { %p5127_p1 = scmp.ne.s32.totalorder %s5126_s4, 0 }
 0x10f   : > { %s5130_s1 = smov %s5129_s21  ;;  %s4265_s16 = scalar_lea.hbm %s5129_s21, %s5121_s7 }
 0x110   : > { %2940 = dma.hbm_to_vmem [thread:$0]  (!%p5127_p1), %s4230_s27, 2048, %s4233_s0, %s5128_s6, %s5070_s25, %s5070_s25, %s5116_s3  }
 0x111   : > { %s3373_s14 = scalar_lea.hbm %s4265_s16, 2048  ;;  %s3378_s0 = scalar_lea.hbm %s5130_s1, 4096 }
 0x112   : > { %p3374_p2 = scmp.ne.s32.totalorder %s4265_s16, %s3373_s14  ;;  %p3379_p0 = scmp.lt.u32.totalorder %s4265_s16, %s5130_s1 }
 0x113   : > { %p3380_p3 = scmp.lt.u32.totalorder %s3378_s0, %s3373_s14  ;;  %p3382_p5 = scmp.lt.u32.totalorder %s3373_s14, %s4265_s16 }
 0x114   : > { %p3376_p4 = pnand %p3374_p2, %p4042_p8 }
 0x115   : > { %p3381_p9 = por %p3380_p3, %p3379_p0 }
 0x116   : > { %p3377_p13 = pneg %p3376_p4 }
 0x117   : > { %p3383_p7 = por %p3382_p5, %p3381_p9 }
 0x119   : > { %p3384_p11 = pnand %p3383_p7, %p3377_p13 }
 0x11b   : > { %3387 = shalt.err (!%p3384_p11)
}
 0x11c   : > { %s3388_s20 = scalar_lea.vmem %s4268_s17, 2048  ;;  %s3711_s12 = smov [#allocation13]  }
 0x11d   : > { %p3389_p6 = scmp.ne.s32.totalorder %s4268_s17, %s3388_s20  ;;  %s3393_s21 = sshll.u32 %s3711_s12, 4  ;;  %s3394_s21 = int_to_ptr.vmem [resolvable:$false] %s3393_s21 }
 0x11e   : > { %s3395_s29 = scalar_lea.vmem %s3394_s21, 4096  ;;  %p3396_p2 = scmp.lt.s32.totalorder %s4268_s17, %s3394_s21 }
 0x11f   : > { %p3391_p10 = pnand %p3389_p6, %p4042_p8  ;;  %p3397_p4 = scmp.lt.s32.totalorder %s3395_s29, %s3388_s20 }
 0x121   : > { %p3392_p12 = pneg %p3391_p10  ;;  %p3398_p0 = por %p3397_p4, %p3396_p2 }
 0x123   : > { %p3399_p3 = pnand %p3398_p0, %p3392_p12 }
 0x125   : > { %3402 = shalt.err (!%p3399_p3)
}
 0x126   : > { %s5131_s14 = scalar_lea.sflag [#allocation12], %s3880_s10  ;;  %s5132_s0 = sld [smem:[#allocation60_spill]] }
 0x127   : > { %2946 = dma.hbm_to_vmem [thread:$0]  (!%p5127_p1), %s4265_s16, 2048, %s4268_s17, %s5131_s14, %s5070_s25, %s5070_s25, %s5116_s3  }
 0x128   : > { %s530_s6 = scalar_lea.vmem [#allocation14], %s5122_s22  ;;  %s5133_s10 = sand.u32 1, %s3647_s18  }
 0x129   : > { %s537_s20 = sshll.u32 %s530_s6, 4  ;;  %s4307_s12 = scalar_lea.sflag [#allocation15], %s5133_s10  ;;  %s4303_s20 = int_to_ptr.vmem [resolvable:$true] %s537_s20 }
 0x12c   : > { %s4300_s26 = scalar_lea.hbm %s5132_s0, %s5121_s7  ;;  %s3408_s7 = scalar_lea.hbm %s5132_s0, 4096 }
 0x12d   : > { %s3403_s21 = scalar_lea.hbm %s4300_s26, 2048  ;;  %p3409_p7 = scmp.lt.u32.totalorder %s4300_s26, %s5132_s0 }
 0x12e   : > { %p3404_p13 = scmp.ne.s32.totalorder %s4300_s26, %s3403_s21  ;;  %p3410_p11 = scmp.lt.u32.totalorder %s3408_s7, %s3403_s21 }
 0x12f   : > { %p3412_p10 = scmp.lt.u32.totalorder %s3403_s21, %s4300_s26 }
 0x130   : > { %p3406_p9 = pnand %p3404_p13, %p4042_p8  ;;  %p3411_p6 = por %p3410_p11, %p3409_p7 }
 0x132   : > { %p3407_p5 = pneg %p3406_p9  ;;  %p3413_p12 = por %p3412_p10, %p3411_p6 }
 0x134   : > { %p3414_p2 = pnand %p3413_p12, %p3407_p5 }
 0x136   : > { %3417 = shalt.err (!%p3414_p2)
}
 0x137   : > { %s3418_s22 = scalar_lea.vmem %s4303_s20, 2048  ;;  %s3712_s19 = smov [#allocation14]  }
 0x138   : > { %p3419_p4 = scmp.ne.s32.totalorder %s4303_s20, %s3418_s22  ;;  %s3423_s27 = sshll.u32 %s3712_s19, 4  ;;  %s3424_s27 = int_to_ptr.vmem [resolvable:$false] %s3423_s27 }
 0x139   : > { %s3425_s6 = scalar_lea.vmem %s3424_s27, 4096  ;;  %p3426_p13 = scmp.lt.s32.totalorder %s4303_s20, %s3424_s27 }
 0x13a   : > { %p3421_p0 = pnand %p3419_p4, %p4042_p8  ;;  %p3427_p9 = scmp.lt.s32.totalorder %s3425_s6, %s3418_s22 }
 0x13c   : > { %p3422_p3 = pneg %p3421_p0  ;;  %p3428_p7 = por %p3427_p9, %p3426_p13 }
 0x13e   : > { %p3429_p11 = pnand %p3428_p7, %p3422_p3 }
 0x140   : > { %3432 = shalt.err (!%p3429_p11)
}
 0x141   : > { %2949 = dma.hbm_to_vmem [thread:$0]  (!%p5127_p1), %s4300_s26, 2048, %s4303_s20, %s4307_s12, %s5070_s25, %s5070_s25, %s5116_s3  }
 0x142   : > { %s5134_s2 = sld [smem:[#allocation38_spill]] }
 0x148   : > { %p5135_p8 = scmp.ne.s32.totalorder %s5134_s2, 0 }
 0x149   : > { %s5136_s10 = sld [smem:[#allocation47_spill]] (!%p5135_p8)  ;;  %s551_s21 = sand.u32 (!%p5135_p8), 1, %s3667_s23  }
 0x14a   : > { %549 = sbr.rel (%p5135_p8) target bundleno = 887 (0x377), region = 52  ;;  %s2358_s16 = sshll.u32 (!%p5135_p8), %s551_s21, 7 }
 0x14b   : > { %s552_s17 = scalar_lea.sflag (!%p5135_p8), [#allocation3], %s551_s21  ;;  %s4337_s7 = scalar_lea.vmem (!%p5135_p8), [#allocation2], %s2358_s16 }
 0x14f   : > { %p5137_p5 = scmp.ne.s32.totalorder (!%p5135_p8), %s5136_s10, 0 }
 0x151   : > { %3594 = dma.done.wait (%p5137_p5), %s552_s17, 2048  }
 0x152   : > { %3596 = vsyncadd (%p5137_p5), %s552_s17, 4294965248  ;;  %s5138_s4 = sld [smem:[#allocation32_spill]]  ;;  %s5139_s29 = sld [smem:[#allocation40_spill]] }
 0x153   : > { %s4344_s14 = sand.u32 1, %s3979_s13  }
 0x154   : > { %s561_s26 = scalar_lea.sflag [#allocation6], %s4344_s14 }
 0x158   : > { %s562_s25 = sand.u32 1, %s5138_s4   ;;  %p5140_p1 = scmp.ne.s32.totalorder %s5139_s29, 0 }
 0x159   : > { %s2359_s3 = sshll.u32 %s562_s25, 7 }
 0x15a   : > { %s4348_s20 = scalar_lea.vmem [#allocation5], %s2359_s3 }
 0x15b   : > { %3598 = dma.done.wait (%p5140_p1), %s561_s26, 4096  }
 0x15c   : > { %3600 = vsyncadd (%p5140_p1), %s561_s26, 4294963200  ;;  %s4354_s12 = scalar_lea.vmem [#allocation7], %s2359_s3  ;;  %s579_s22 = scalar_lea.sflag [#allocation9], %s4344_s14 }
 0x15d   : > { %s4357_s19 = scalar_lea.vmem [#allocation8], %s2359_s3 }
 0x15e   : > { %3602 = dma.done.wait (%p5140_p1), %s579_s22, 2048  }
 0x15f   : > { %3604 = vsyncadd (%p5140_p1), %s579_s22, 4294965248  ;;  %s5141_s13 = sld [smem:[#allocation31_spill]] }
 0x160   : > { %s5142_s27 = sld [smem:[#allocation41_spill]] }
 0x165   : > { %s589_s6 = sand.u32 1, %s5141_s13  }
 0x166   : > { %s2362_s2 = sshll.u32 %s589_s6, 7  ;;  %p5143_p6 = scmp.ne.s32.totalorder %s5142_s27, 0 }
 0x167   : > { %s4364_s10 = scalar_lea.vmem [#allocation10], %s2362_s2 }
 0x168   : > { %3606 = dma.done.wait (%p5143_p6), %s579_s22, 2048  }
 0x169   : > { %3608 = vsyncadd (%p5143_p6), %s579_s22, 4294965248  ;;  %s597_s21 = scalar_lea.sflag [#allocation12], %s4344_s14  ;;  %s4371_s16 = scalar_lea.vmem [#allocation11], %s2362_s2 }
 0x16a   : > { %3610 = dma.done.wait (%p5143_p6), %s597_s21, 4096  }
 0x16b   : > { %3612 = vsyncadd (%p5143_p6), %s597_s21, 4294963200  ;;  %s4377_s17 = scalar_lea.vmem [#allocation13], %s2362_s2  ;;  %s615_s4 = scalar_lea.sflag [#allocation15], %s589_s6 }
 0x16c   : > { %s4379_s29 = scalar_lea.vmem [#allocation14], %s2362_s2 }
 0x16d   : > { %3614 = dma.done.wait (%p5143_p6), %s615_s4, 2048  }
 0x16e   : > { %3616 = vsyncadd (%p5143_p6), %s615_s4, 4294965248  ;;  %v3121_v0 = vld [vmem:[%s4348_s20 + $0x40] sm:$0xff]   ;;  %v3123_v2 = vld [vmem:[%s4348_s20 + $0x48] sm:$0xff]   ;;  %s5144_s25 = sld [smem:[#allocation29_spill]]  ;;  %s5146_s13 = sld [smem:[#allocation35_spill]] }
 0x16f   : > { %v3122_v1 = vld [vmem:[%s4348_s20] sm:$0xff]   ;;  %2695 = vmatprep.subr.bf16.mxu0 %v3121_v0  ;;  %2887 = vmatprep.subr.bf16.mxu1 %v3121_v0  ;;  %v3124_v3 = vld [vmem:[%s4348_s20 + $0x8] sm:$0xff]   ;;  %v3125_v4 = vld [vmem:[%s4348_s20 + $0x50] sm:$0xff]   ;;  %s5147_s27 = sld [smem:[#allocation36_spill]]  ;;  %s5152_s1 = sld [smem:[#allocation61_spill]] }
 0x170   : > { %2696 = vmatpush3.bf16.msra.mxu0 %v3122_v1  ;;  %2895 = vmatpush3.bf16.msra.mxu1 %v3122_v1  ;;  %v3126_v5 = vld [vmem:[%s4348_s20 + $0x10] sm:$0xff]   ;;  %v3127_v6 = vld [vmem:[%s4348_s20 + $0x58] sm:$0xff]   ;;  %v3129_v8 = vld [vmem:[%s4348_s20 + $0x60] sm:$0xff]  }
 0x171   : > { %2697 = vmatprep.subr.bf16.mxu0 %v3123_v2  ;;  %2888 = vmatprep.subr.bf16.mxu1 %v3123_v2  ;;  %v3128_v7 = vld [vmem:[%s4348_s20 + $0x18] sm:$0xff]   ;;  %v3130_v9 = vld [vmem:[%s4348_s20 + $0x20] sm:$0xff]   ;;  %v3131_v10 = vld [vmem:[%s4348_s20 + $0x68] sm:$0xff]  }
 0x172   : > { %v4397_v11 = vld [vmem:[%s4337_s7 + $0x4] ss:$8 sps:$4 sm:$0xff]   ;;  %v3133_v14 = vld [vmem:[%s4348_s20 + $0x70] sm:$0xff]   ;;  %v3135_v16 = vld [vmem:[%s4348_s20 + $0x78] sm:$0xff]  }
 0x173   : > { %v4400_v12 = vld [vmem:[%s4337_s7 + $0x44] ss:$8 sps:$4 sm:$0xff]   ;;  %1029 = vmatprep.mubr.bf16.mxu0 %v4397_v11  ;;  %v3134_v15 = vld [vmem:[%s4348_s20 + $0x30] sm:$0xff]   ;;  %v3136_v17 = vld [vmem:[%s4348_s20 + $0x38] sm:$0xff]  }
 0x174   : > { %2698 = vmatpush3.bf16.msra.mxu0 %v3124_v3  ;;  %2896 = vmatpush3.bf16.msra.mxu1 %v3124_v3  ;;  %v3132_v13 = vld [vmem:[%s4348_s20 + $0x28] sm:$0xff]   ;;  %v3143_v18 = vld [vmem:[%s4354_s12 + $0x40] sm:$0xff]   ;;  %v4419_v23 = vld [vmem:[%s4337_s7 + $0x14] ss:$8 sps:$4 sm:$0xff]   ;;  %s5034_s3 = sand.u32 1, %s5144_s25  }
 0x175   : > { %2699 = vmatprep.subr.bf16.mxu0 %v3125_v4  ;;  %2889 = vmatprep.subr.bf16.mxu1 %v3125_v4  ;;  %v4411_v19 = vld [vmem:[%s4337_s7] ss:$8 sps:$4 sm:$0xff]   ;;  %v4422_v24 = vld [vmem:[%s4337_s7 + $0x54] ss:$8 sps:$4 sm:$0xff]   ;;  %v4430_v26 = vld [vmem:[%s4337_s7 + $0x10] ss:$8 sps:$4 sm:$0xff]  }
 0x176   : > { %1061 = vmatprep.mubr.bf16.mxu1 %v4400_v12  ;;  %v4414_v20 = vld [vmem:[%s4337_s7 + $0x40] ss:$8 sps:$4 sm:$0xff]   ;;  %v3153_v27 = vld [vmem:[%s4354_s12 + $0x50] sm:$0xff]   ;;  %v3155_v30 = vld [vmem:[%s4354_s12 + $0x58] sm:$0xff]   ;;  %s4605_s26 = sshll.u32 %s5034_s3, 6  ;;  %s2486_s21 = sshll.u32 %s5147_s27, 6 }
 0x177   : > { %v3144_v21 = vld [vmem:[%s4354_s12] sm:$0xff]   ;;  %v3145_v22 = vld [vmem:[%s4354_s12 + $0x48] sm:$0xff]   ;;  %v4434_v28 = vld [vmem:[%s4337_s7 + $0x50] ss:$8 sps:$4 sm:$0xff]   ;;  %s4614_s20 = scalar_lea.vmem [#allocation19], %s4605_s26  ;;  %s4731_s22 = scalar_lea.vmem [#allocation17], %s4605_s26 }
 0x178   : > { %2700 = vmatpush3.bf16.msra.mxu0 %v3126_v5  ;;  %2897 = vmatpush3.bf16.msra.mxu1 %v3126_v5  ;;  %v3146_v25 = vld [vmem:[%s4354_s12 + $0x8] sm:$0xff]   ;;  %v3154_v29 = vld [vmem:[%s4354_s12 + $0x10] sm:$0xff]   ;;  %v3156_v33 = vld [vmem:[%s4354_s12 + $0x18] sm:$0xff]   ;;  %s5149_s27 = sld [smem:[#allocation62_spill]] }
 0x179   : > { %2701 = vmatprep.subr.bf16.mxu0 %v3127_v6  ;;  %2890 = vmatprep.subr.bf16.mxu1 %v3127_v6  ;;  %v4439_v31 = vld [vmem:[%s4337_s7 + $0x24] ss:$8 sps:$4 sm:$0xff]   ;;  %v4452_v36 = vld [vmem:[%s4337_s7 + $0x20] ss:$8 sps:$4 sm:$0xff]   ;;  %v4462_v42 = vld [vmem:[%s4337_s7 + $0x34] ss:$8 sps:$4 sm:$0xff]  }
 0x17a   : > { %v4442_v32 = vld [vmem:[%s4337_s7 + $0x64] ss:$8 sps:$4 sm:$0xff]   ;;  %v4455_v37 = vld [vmem:[%s4337_s7 + $0x60] ss:$8 sps:$4 sm:$0xff]   ;;  %v4465_v43 = vld [vmem:[%s4337_s7 + $0x74] ss:$8 sps:$4 sm:$0xff]  }
 0x17b   : > { %v3163_v34 = vld [vmem:[%s4354_s12 + $0x60] sm:$0xff]   ;;  %v3179_v40 = vld [vmem:[%s4357_s19 + $0x48] sm:$0xff]   ;;  %v3181_v45 = vld [vmem:[%s4357_s19 + $0x50] sm:$0xff]  }
 0x17c   : > { %2702 = vmatpush3.bf16.msra.mxu0 %v3128_v7  ;;  %2898 = vmatpush3.bf16.msra.mxu1 %v3128_v7  ;;  %v3177_v35 = vld [vmem:[%s4357_s19 + $0x40] sm:$0xff]   ;;  %v3165_v41 = vld [vmem:[%s4354_s12 + $0x68] sm:$0xff]   ;;  %v3171_v47 = vld [vmem:[%s4337_s7 + $0x30] ss:$8 sps:$4 sm:$0xff]  }
 0x17d   : > { %2703 = vmatprep.subr.bf16.mxu0 %v3129_v8  ;;  %2891 = vmatprep.subr.bf16.mxu1 %v3129_v8  ;;  %v3178_v38 = vld [vmem:[%s4357_s19] sm:$0xff]   ;;  %v3180_v44 = vld [vmem:[%s4357_s19 + $0x8] sm:$0xff]   ;;  %v4476_v48 = vld [vmem:[%s4337_s7 + $0x70] ss:$8 sps:$4 sm:$0xff]   ;;  %s5035_s7 = smov 64  }
 0x17e   : > { %v3164_v39 = vld [vmem:[%s4354_s12 + $0x20] sm:$0xff]   ;;  %v3166_v46 = vld [vmem:[%s4354_s12 + $0x28] sm:$0xff]   ;;  %v3173_v49 = vld [vmem:[%s4354_s12 + $0x70] sm:$0xff]  }
 0x17f   : > { %v3182_v50 = vld [vmem:[%s4357_s19 + $0x10] sm:$0xff]   ;;  %v3175_v52 = vld [vmem:[%s4354_s12 + $0x78] sm:$0xff]   ;;  %v3185_v55 = vld [vmem:[%s4357_s19 + $0x60] sm:$0xff]  }
 0x180   : > { %2704 = vmatpush3.bf16.msra.mxu0 %v3130_v9  ;;  %2899 = vmatpush3.bf16.msra.mxu1 %v3130_v9  ;;  %v3174_v51 = vld [vmem:[%s4354_s12 + $0x30] sm:$0xff]   ;;  %v3183_v53 = vld [vmem:[%s4357_s19 + $0x58] sm:$0xff]   ;;  %v3186_v57 = vld [vmem:[%s4357_s19 + $0x20] sm:$0xff]  }
 0x181   : > { %2705 = vmatprep.subr.bf16.mxu0 %v3131_v10  ;;  %2892 = vmatprep.subr.bf16.mxu1 %v3131_v10  ;;  %v3184_v54 = vld [vmem:[%s4357_s19 + $0x18] sm:$0xff]   ;;  %v3187_v58 = vld [vmem:[%s4357_s19 + $0x68] sm:$0xff]   ;;  %v3189_v60 = vld [vmem:[%s4357_s19 + $0x70] sm:$0xff]  }
 0x182   : > { %v3176_v56 = vld [vmem:[%s4354_s12 + $0x38] sm:$0xff]   ;;  %v3188_v59 = vld [vmem:[%s4357_s19 + $0x28] sm:$0xff]   ;;  %v3190_v61 = vld [vmem:[%s4357_s19 + $0x30] sm:$0xff]   ;;  %s4685_s12 = scalar_lea.vmem [#allocation16], %s4605_s26  ;;  %s1992_s26 = sshll.u32 %s4731_s22, 4  ;;  %s4787_s26 = int_to_ptr.vmem [resolvable:$true] %s1992_s26 }
 0x183   : > { %v3191_v62 = vld [vmem:[%s4357_s19 + $0x78] sm:$0xff]  }
 0x184   : > { %2706 = vmatpush3.bf16.msra.mxu0 %v3132_v13  ;;  %2900 = vmatpush3.bf16.msra.mxu1 %v3132_v13  ;;  %v3192_v63 = vld [vmem:[%s4357_s19 + $0x38] sm:$0xff]   ;;  %s5145_s19 = sld [smem:[#allocation34_spill]] }
 0x185   : > { %2707 = vmatprep.subr.bf16.mxu0 %v3133_v14  ;;  %2893 = vmatprep.subr.bf16.mxu1 %v3133_v14 }
 0x188   : > { %2708 = vmatpush3.bf16.msra.mxu0 %v3134_v15  ;;  %2901 = vmatpush3.bf16.msra.mxu1 %v3134_v15 }
 0x189   : > { %2709 = vmatprep.subr.bf16.mxu0 %v3135_v16  ;;  %2894 = vmatprep.subr.bf16.mxu1 %v3135_v16 }
 0x18a   : > { %s2551_s6 = sshll.u32 %s5145_s19, 5  ;;  %s1972_s19 = sshll.u32 %s4685_s12, 4  ;;  %s4804_s19 = int_to_ptr.vmem [resolvable:$true] %s1972_s19 }
 0x18b   : > { %s1967_s2 = sadd.s32 %s5146_s13, %s2551_s6  ;;  %s5148_s13 = sld [smem:[#allocation52_spill]] }
 0x18c   : > { %2710 = vmatpush3.bf16.msra.mxu0 %v3136_v17  ;;  %2902 = vmatpush3.bf16.msra.mxu1 %v3136_v17  ;;  %s1969_s4 = sadd.s32 %s2486_s21, %s1967_s2  ;;  %s5150_s6 = smov %s5149_s27 }
 0x18d   : > { %2759 = vmatprep.subr.bf16.mxu1 %v3143_v18  ;;  %2823 = vmatprep.subr.bf16.mxu0 %v3177_v35 }
 0x18f   : > { %1030 = vmatmul.mubr.bf16.vlgmr.msra.gmra.mrb[0].mxu0 %v4411_v19  ;;  %1062 = vmatmul.mubr.bf16.vlgmr.msra.gmra.mrb[0].mxu1 %v4414_v20 }
 0x190   : > { %2760 = vmatpush3.bf16.msra.mxu1 %v3144_v21  ;;  %1037 = vmatprep.mubr.bf16.mxu0 %v4419_v23 }
 0x191   : > { %2761 = vmatprep.subr.bf16.mxu1 %v3145_v22  ;;  %1069 = vmatprep.mubr.bf16.mxu1 %v4422_v24  ;;  %p5153_p12 = scmp.ne.s32.totalorder %s5148_s13, 0 }
 0x192   : > { %2824 = vmatpush3.bf16.msra.mxu0 %v3178_v38 }
 0x193   : > { %2825 = vmatprep.subr.bf16.mxu0 %v3179_v40 }
 0x194   : > { %2762 = vmatpush3.bf16.msra.mxu1 %v3146_v25 }
 0x195   : > { %2763 = vmatprep.subr.bf16.mxu1 %v3153_v27 }
 0x196   : > { %2826 = vmatpush3.bf16.msra.mxu0 %v3180_v44 }
 0x197   : > { %1038 = vmatmul.mubr.bf16.gmra.mrb[4].mxu0 %v4430_v26  ;;  %1070 = vmatmul.mubr.bf16.gmra.mrb[4].mxu1 %v4434_v28 }
 0x198   : > { %2764 = vmatpush3.bf16.msra.mxu1 %v3154_v29  ;;  %1045 = vmatprep.mubr.bf16.mxu0 %v4439_v31 }
 0x199   : > { %2765 = vmatprep.subr.bf16.mxu1 %v3155_v30  ;;  %1077 = vmatprep.mubr.bf16.mxu1 %v4442_v32 }
 0x19a   : > { %2827 = vmatprep.subr.bf16.mxu0 %v3181_v45 }
 0x19b   : > { %2828 = vmatpush3.bf16.msra.mxu0 %v3182_v50 }
 0x19c   : > { %2766 = vmatpush3.bf16.msra.mxu1 %v3156_v33  ;;  %2829 = vmatprep.subr.bf16.mxu0 %v3183_v53 }
 0x19d   : > { %2767 = vmatprep.subr.bf16.mxu1 %v3163_v34 }
 0x19f   : > { %1046 = vmatmul.mubr.bf16.gmra.mrb[8].mxu0 %v4452_v36  ;;  %1078 = vmatmul.mubr.bf16.gmra.mrb[8].mxu1 %v4455_v37 }
 0x1a0   : > { %2768 = vmatpush3.bf16.msra.mxu1 %v3164_v39  ;;  %1053 = vmatprep.mubr.bf16.mxu0 %v4462_v42 }
 0x1a1   : > { %2769 = vmatprep.subr.bf16.mxu1 %v3165_v41  ;;  %1085 = vmatprep.mubr.bf16.mxu1 %v4465_v43 }
 0x1a2   : > { %2830 = vmatpush3.bf16.msra.mxu0 %v3184_v54 }
 0x1a3   : > { %2831 = vmatprep.subr.bf16.mxu0 %v3185_v55 }
 0x1a4   : > { %2770 = vmatpush3.bf16.msra.mxu1 %v3166_v46 }
 0x1a5   : > { %2771 = vmatprep.subr.bf16.mxu1 %v3173_v49 }
 0x1a6   : > { %2832 = vmatpush3.bf16.msra.mxu0 %v3186_v57 }
 0x1a7   : > { %1054 = vmatmul.mubr.bf16.gmra.mrb[12].mxu0 %v3171_v47  ;;  %1086 = vmatmul.mubr.bf16.gmra.mrb[12].mxu1 %v4476_v48 }
 0x1a8   : > { %2772 = vmatpush3.bf16.msra.mxu1 %v3174_v51  ;;  %1222 = vmatprep.mubr.bf16.mxu1 %v4397_v11 }
 0x1a9   : > { %2773 = vmatprep.subr.bf16.mxu1 %v3175_v52  ;;  %1415 = vmatprep.mubr.bf16.mxu0 %v4397_v11 }
 0x1aa   : > { %2833 = vmatprep.subr.bf16.mxu0 %v3187_v58 }
 0x1ab   : > { %2834 = vmatpush3.bf16.msra.mxu0 %v3188_v59 }
 0x1ac   : > { %2774 = vmatpush3.bf16.msra.mxu1 %v3176_v56  ;;  %2835 = vmatprep.subr.bf16.mxu0 %v3189_v60 }
 0x1af   : > { %1223 = vmatmul.mubr.bf16.vlgmr.msra.gmra.mrb[16].mxu1 %v4411_v19  ;;  %2836 = vmatpush3.bf16.msra.mxu0 %v3190_v61 }
 0x1b0   : > { %1230 = vmatprep.mubr.bf16.mxu1 %v4419_v23  ;;  %2837 = vmatprep.subr.bf16.mxu0 %v3191_v62 }
 0x1b3   : > { %2838 = vmatpush3.bf16.msra.mxu0 %v3192_v63 }
 0x1b6   : > { %1416 = vmatmul.mubr.bf16.vlgmr.msra.gmra.mrb[16].mxu0 %v4411_v19 }
 0x1b7   : > { %1231 = vmatmul.mubr.bf16.gmra.mrb[20].mxu1 %v4430_v26  ;;  %1423 = vmatprep.mubr.bf16.mxu0 %v4419_v23 }
 0x1b8   : > { %1238 = vmatprep.mubr.bf16.mxu1 %v4439_v31 }
 0x1be   : > { %1424 = vmatmul.mubr.bf16.gmra.mrb[20].mxu0 %v4430_v26 }
 0x1bf   : > { %1239 = vmatmul.mubr.bf16.gmra.mrb[24].mxu1 %v4452_v36  ;;  %1431 = vmatprep.mubr.bf16.mxu0 %v4439_v31 }
 0x1c0   : > { %1246 = vmatprep.mubr.bf16.mxu1 %v4462_v42 }
 0x1c6   : > { %1432 = vmatmul.mubr.bf16.gmra.mrb[24].mxu0 %v4452_v36 }
 0x1c7   : > { %1247 = vmatmul.mubr.bf16.gmra.mrb[28].mxu1 %v3171_v47  ;;  %1439 = vmatprep.mubr.bf16.mxu0 %v4462_v42 }
 0x1c8   : > { %1254 = vmatprep.mubr.bf16.mxu1 %v4400_v12 }
 0x1ce   : > { %1440 = vmatmul.mubr.bf16.gmra.mrb[28].mxu0 %v3171_v47 }
 0x1cf   : > { %1255 = vmatmul.mubr.bf16.gmra.mrb[32].mxu1 %v4414_v20  ;;  %1447 = vmatprep.mubr.bf16.mxu0 %v4400_v12 }
 0x1d0   : > { %1262 = vmatprep.mubr.bf16.mxu1 %v4422_v24 }
 0x1d6   : > { %1448 = vmatmul.mubr.bf16.gmra.mrb[32].mxu0 %v4414_v20 }
 0x1d7   : > { %1263 = vmatmul.mubr.bf16.gmra.mrb[36].mxu1 %v4434_v28  ;;  %1455 = vmatprep.mubr.bf16.mxu0 %v4422_v24 }
 0x1d8   : > { %1270 = vmatprep.mubr.bf16.mxu1 %v4442_v32 }
 0x1de   : > { %1456 = vmatmul.mubr.bf16.gmra.mrb[36].mxu0 %v4434_v28 }
 0x1df   : > { %1271 = vmatmul.mubr.bf16.gmra.mrb[40].mxu1 %v4455_v37  ;;  %1463 = vmatprep.mubr.bf16.mxu0 %v4442_v32 }
 0x1e0   : > { %1278 = vmatprep.mubr.bf16.mxu1 %v4465_v43 }
 0x1e6   : > { %1464 = vmatmul.mubr.bf16.gmra.mrb[40].mxu0 %v4455_v37 }
 0x1e7   : > { %1279 = vmatmul.mubr.bf16.gmra.mrb[44].mxu1 %v4476_v48  ;;  %1471 = vmatprep.mubr.bf16.mxu0 %v4465_v43 }
 0x1ee   : > { %1472 = vmatmul.mubr.bf16.gmra.mrb[44].mxu0 %v4476_v48 }
 0x262   : > { %v2711_v0 = vpop.f32.mrb[0].mxu0  ;;  %v2735_v1 = vpop.f32.mrb[0].mxu1 }
 0x263   : > { %v2712_v2 = vpop.f32.mrb[1].mxu0  ;;  %v2736_v3 = vpop.f32.mrb[1].mxu1 }
 0x264   : > { %v4524_v4 = vadd.f32 %v2712_v2, %v2711_v0  ;;  %v4526_v5 = vadd.f32 %v2736_v3, %v2735_v1  ;;  %v2714_v6 = vpop.f32.mrb[2].mxu0  ;;  %v2738_v7 = vpop.f32.mrb[2].mxu1 }
 0x265   : > { %v2715_v8 = vpop.f32.mrb[3].mxu0  ;;  %v2739_v9 = vpop.f32.mrb[3].mxu1 }
 0x266   : > { %v4528_v10 = vadd.f32 %v2715_v8, %v2714_v6  ;;  %v4530_v11 = vadd.f32 %v2739_v9, %v2738_v7  ;;  %1560 = vrot.lane.b32.xlu0 %v4524_v4, %s5035_s7 }
 0x268   : > { %1562 = vrot.lane.b32.xlu1 %v4528_v10, %s5035_s7 }
 0x26a   : > { %v2717_v12 = vpop.f32.mrb[4].mxu0  ;;  %v2741_v13 = vpop.f32.mrb[4].mxu1  ;;  %1576 = vrot.lane.b32.xlu0 %v4526_v5, %s5035_s7 }
 0x26b   : > { %v2718_v14 = vpop.f32.mrb[5].mxu0  ;;  %v2742_v15 = vpop.f32.mrb[5].mxu1 }
 0x26c   : > { %v4538_v16 = vadd.f32 %v2718_v14, %v2717_v12  ;;  %v4540_v17 = vadd.f32 %v2742_v15, %v2741_v13  ;;  %v2720_v18 = vpop.f32.mrb[6].mxu0  ;;  %v2744_v19 = vpop.f32.mrb[6].mxu1  ;;  %1578 = vrot.lane.b32.xlu1 %v4530_v11, %s5035_s7 }
 0x26d   : > { %v2721_v20 = vpop.f32.mrb[7].mxu0  ;;  %v2745_v21 = vpop.f32.mrb[7].mxu1 }
 0x26e   : > { %v4544_v22 = vadd.f32 %v2721_v20, %v2720_v18  ;;  %v4546_v23 = vadd.f32 %v2745_v21, %v2744_v19  ;;  %1564 = vrot.lane.b32.xlu0 %v4538_v16, %s5035_s7 }
 0x270   : > { %1566 = vrot.lane.b32.xlu1 %v4544_v22, %s5035_s7 }
 0x272   : > { %v2723_v24 = vpop.f32.mrb[8].mxu0  ;;  %v2747_v25 = vpop.f32.mrb[8].mxu1  ;;  %1580 = vrot.lane.b32.xlu0 %v4540_v17, %s5035_s7 }
 0x273   : > { %v2724_v26 = vpop.f32.mrb[9].mxu0  ;;  %v2748_v27 = vpop.f32.mrb[9].mxu1 }
 0x274   : > { %v4554_v28 = vadd.f32 %v2724_v26, %v2723_v24  ;;  %v4556_v29 = vadd.f32 %v2748_v27, %v2747_v25  ;;  %v2726_v30 = vpop.f32.mrb[10].mxu0  ;;  %v2750_v31 = vpop.f32.mrb[10].mxu1  ;;  %1582 = vrot.lane.b32.xlu1 %v4546_v23, %s5035_s7 }
 0x275   : > { %v2727_v32 = vpop.f32.mrb[11].mxu0  ;;  %v2751_v33 = vpop.f32.mrb[11].mxu1 }
 0x276   : > { %v4560_v34 = vadd.f32 %v2727_v32, %v2726_v30  ;;  %v4562_v35 = vadd.f32 %v2751_v33, %v2750_v31  ;;  %1568 = vrot.lane.b32.xlu0 %v4554_v28, %s5035_s7 }
 0x278   : > { %1570 = vrot.lane.b32.xlu1 %v4560_v34, %s5035_s7 }
 0x27a   : > { %v2729_v36 = vpop.f32.mrb[12].mxu0  ;;  %v2753_v37 = vpop.f32.mrb[12].mxu1  ;;  %1584 = vrot.lane.b32.xlu0 %v4556_v29, %s5035_s7 }
 0x27b   : > { %v2730_v38 = vpop.f32.mrb[13].mxu0  ;;  %v2754_v39 = vpop.f32.mrb[13].mxu1 }
 0x27c   : > { %v4570_v40 = vadd.f32 %v2730_v38, %v2729_v36  ;;  %v4572_v41 = vadd.f32 %v2754_v39, %v2753_v37  ;;  %v2732_v42 = vpop.f32.mrb[14].mxu0  ;;  %v2756_v43 = vpop.f32.mrb[14].mxu1  ;;  %1586 = vrot.lane.b32.xlu1 %v4562_v35, %s5035_s7 }
 0x27d   : > { %v2733_v44 = vpop.f32.mrb[15].mxu0  ;;  %v2757_v45 = vpop.f32.mrb[15].mxu1 }
 0x27e   : > { %v4576_v46 = vadd.f32 %v2733_v44, %v2732_v42  ;;  %v4578_v47 = vadd.f32 %v2757_v45, %v2756_v43  ;;  %1572 = vrot.lane.b32.xlu0 %v4570_v40, %s5035_s7 }
 0x280   : > { %1574 = vrot.lane.b32.xlu1 %v4576_v46, %s5035_s7 }
 0x282   : > { %v2775_v48 = vpop.f32.mrb[16].mxu1 }
 0x283   : > { %v2776_v49 = vpop.f32.mrb[17].mxu1 }
 0x284   : > { %v4584_v50 = vadd.f32 %v2776_v49, %v2775_v48  ;;  %v2778_v51 = vpop.f32.mrb[18].mxu1 }
 0x285   : > { %v2779_v52 = vpop.f32.mrb[19].mxu1 }
 0x286   : > { %v4586_v53 = vadd.f32 %v2779_v52, %v2778_v51  ;;  %1640 = vrot.lane.b32.xlu0 %v4584_v50, %s5035_s7 }
 0x289   : > { %v2839_v60 = vpop.f32.mrb[16].mxu0 }
 0x28a   : > { %v2781_v54 = vpop.f32.mrb[20].mxu1  ;;  %1642 = vrot.lane.b32.xlu0 %v4586_v53, %s5035_s7  ;;  %v2840_v61 = vpop.f32.mrb[17].mxu0 }
 0x28b   : > { %v2782_v55 = vpop.f32.mrb[21].mxu1  ;;  %v2841_v63 = vadd.f32 %v2840_v61, %v2839_v60  ;;  %v2842_v0 = vpop.f32.mrb[18].mxu0 }
 0x28c   : > { %v4592_v56 = vadd.f32 %v2782_v55, %v2781_v54  ;;  %v2784_v57 = vpop.f32.mrb[22].mxu1  ;;  %v2843_v2 = vpop.f32.mrb[19].mxu0 }
 0x28d   : > { %v2785_v58 = vpop.f32.mrb[23].mxu1  ;;  %v2844_v7 = vadd.f32 %v2843_v2, %v2842_v0 }
 0x28e   : > { %v4594_v59 = vadd.f32 %v2785_v58, %v2784_v57  ;;  %1644 = vrot.lane.b32.xlu1 %v4592_v56, %s5035_s7 }
 0x28f   : > { %v2637_v12 = vpack.c.bf16 %v2844_v7, %v2841_v63 }
 0x291   : > { %2638 = vst [vmem:[%s4614_s20] sm:$0xff] %v2637_v12   ;;  %v2845_v13 = vpop.f32.mrb[20].mxu0 }
 0x292   : > { %v2787_v62 = vpop.f32.mrb[24].mxu1  ;;  %1646 = vrot.lane.b32.xlu1 %v4594_v59, %s5035_s7  ;;  %v2846_v14 = vpop.f32.mrb[21].mxu0 }
 0x293   : > { %v2788_v1 = vpop.f32.mrb[25].mxu1  ;;  %v2847_v18 = vadd.f32 %v2846_v14, %v2845_v13  ;;  %v2848_v19 = vpop.f32.mrb[22].mxu0 }
 0x294   : > { %v4601_v3 = vadd.f32 %v2788_v1, %v2787_v62  ;;  %v2790_v6 = vpop.f32.mrb[26].mxu1  ;;  %v2849_v21 = vpop.f32.mrb[23].mxu0 }
 0x295   : > { %v2791_v8 = vpop.f32.mrb[27].mxu1  ;;  %v2850_v26 = vadd.f32 %v2849_v21, %v2848_v19 }
 0x296   : > { %v4607_v9 = vadd.f32 %v2791_v8, %v2790_v6  ;;  %1648 = vrot.lane.b32.xlu0 %v4601_v3, %s5035_s7 }
 0x297   : > { %v2642_v31 = vpack.c.bf16 %v2850_v26, %v2847_v18 }
 0x298   : > { %1650 = vrot.lane.b32.xlu1 %v4607_v9, %s5035_s7 }
 0x299   : > { %2688 = vst [vmem:[%s4614_s20 + $0x8] sm:$0xff] %v2642_v31   ;;  %v2851_v32 = vpop.f32.mrb[24].mxu0 }
 0x29a   : > { %v2793_v15 = vpop.f32.mrb[28].mxu1  ;;  %v2852_v33 = vpop.f32.mrb[25].mxu0 }
 0x29b   : > { %v2794_v20 = vpop.f32.mrb[29].mxu1  ;;  %v2853_v37 = vadd.f32 %v2852_v33, %v2851_v32  ;;  %v2854_v38 = vpop.f32.mrb[26].mxu0 }
 0x29c   : > { %v4617_v24 = vadd.f32 %v2794_v20, %v2793_v15  ;;  %v2796_v25 = vpop.f32.mrb[30].mxu1  ;;  %v2855_v42 = vpop.f32.mrb[27].mxu0 }
 0x29d   : > { %v2797_v27 = vpop.f32.mrb[31].mxu1  ;;  %v2856_v45 = vadd.f32 %v2855_v42, %v2854_v38 }
 0x29e   : > { %v4619_v30 = vadd.f32 %v2797_v27, %v2796_v25  ;;  %1652 = vrot.lane.b32.xlu0 %v4617_v24, %s5035_s7 }
 0x29f   : > { %v2647_v51 = vpack.c.bf16 %v2856_v45, %v2853_v37 }
 0x2a0   : > { %1654 = vrot.lane.b32.xlu1 %v4619_v30, %s5035_s7 }
 0x2a1   : > { %2689 = vst [vmem:[%s4614_s20 + $0x10] sm:$0xff] %v2647_v51   ;;  %v2857_v52 = vpop.f32.mrb[28].mxu0 }
 0x2a2   : > { %v2799_v36 = vpop.f32.mrb[32].mxu1  ;;  %v2858_v54 = vpop.f32.mrb[29].mxu0 }
 0x2a3   : > { %v2800_v39 = vpop.f32.mrb[33].mxu1  ;;  %v2859_v57 = vadd.f32 %v2858_v54, %v2857_v52  ;;  %v2860_v58 = vpop.f32.mrb[30].mxu0 }
 0x2a4   : > { %v4626_v43 = vadd.f32 %v2800_v39, %v2799_v36  ;;  %v2802_v44 = vpop.f32.mrb[34].mxu1  ;;  %v2861_v61 = vpop.f32.mrb[31].mxu0 }
 0x2a5   : > { %v2803_v48 = vpop.f32.mrb[35].mxu1  ;;  %v2862_v0 = vadd.f32 %v2861_v61, %v2860_v58 }
 0x2a6   : > { %v4628_v49 = vadd.f32 %v2803_v48, %v2802_v44  ;;  %1656 = vrot.lane.b32.xlu0 %v4626_v43, %s5035_s7 }
 0x2a7   : > { %v2652_v6 = vpack.c.bf16 %v2862_v0, %v2859_v57 }
 0x2a8   : > { %1658 = vrot.lane.b32.xlu1 %v4628_v49, %s5035_s7 }
 0x2a9   : > { %2690 = vst [vmem:[%s4614_s20 + $0x18] sm:$0xff] %v2652_v6   ;;  %v2863_v7 = vpop.f32.mrb[32].mxu0 }
 0x2aa   : > { %v2805_v55 = vpop.f32.mrb[36].mxu1  ;;  %v2864_v8 = vpop.f32.mrb[33].mxu0 }
 0x2ab   : > { %v2806_v60 = vpop.f32.mrb[37].mxu1  ;;  %v2865_v13 = vadd.f32 %v2864_v8, %v2863_v7  ;;  %v2866_v14 = vpop.f32.mrb[34].mxu0 }
 0x2ac   : > { %v4635_v62 = vadd.f32 %v2806_v60, %v2805_v55  ;;  %v2808_v63 = vpop.f32.mrb[38].mxu1  ;;  %v2867_v18 = vpop.f32.mrb[35].mxu0 }
 0x2ad   : > { %v2809_v1 = vpop.f32.mrb[39].mxu1  ;;  %v2868_v21 = vadd.f32 %v2867_v18, %v2866_v14  ;;  %v1496_v14 = vld [vmem:[%s4371_s16] sm:$0xff]  ;;  %v1481_v18 = vld [vmem:[%s4364_s10 + $0x8] sm:$0xff] }
 0x2ae   : > { %v4637_v2 = vadd.f32 %v2809_v1, %v2808_v63  ;;  %1660 = vrot.lane.b32.xlu0 %v4635_v62, %s5035_s7 }
 0x2af   : > { %v2657_v27 = vpack.c.bf16 %v2868_v21, %v2865_v13  ;;  %v1497_v21 = vld [vmem:[%s4371_s16 + $0x8] sm:$0xff] }
 0x2b0   : > { %1662 = vrot.lane.b32.xlu1 %v4637_v2, %s5035_s7 }
 0x2b1   : > { %2691 = vst [vmem:[%s4614_s20 + $0x20] sm:$0xff] %v2657_v27   ;;  %v2869_v31 = vpop.f32.mrb[36].mxu0 }
 0x2b2   : > { %v2811_v12 = vpop.f32.mrb[40].mxu1  ;;  %v2870_v32 = vpop.f32.mrb[37].mxu0 }
 0x2b3   : > { %v2812_v15 = vpop.f32.mrb[41].mxu1  ;;  %v2871_v36 = vadd.f32 %v2870_v32, %v2869_v31  ;;  %v2872_v37 = vpop.f32.mrb[38].mxu0  ;;  %v1504_v31 = vld [vmem:[%s4371_s16 + $0x40] sm:$0xff] }
 0x2b4   : > { %v4644_v19 = vadd.f32 %v2812_v15, %v2811_v12  ;;  %v2814_v20 = vpop.f32.mrb[42].mxu1  ;;  %v2873_v39 = vpop.f32.mrb[39].mxu0  ;;  %v1480_v15 = vld [vmem:[%s4364_s10] sm:$0xff] }
 0x2b5   : > { %v2815_v25 = vpop.f32.mrb[43].mxu1  ;;  %v2874_v45 = vadd.f32 %v2873_v39, %v2872_v37  ;;  %v1544_v32 = vmul.f32 %v4524_v4, %v1480_v15  ;;  %v1488_v37 = vld [vmem:[%s4364_s10 + $0x40] sm:$0xff]  ;;  %v1490_v15 = vld [vmem:[%s4364_s10 + $0x50] sm:$0xff] }
 0x2b6   : > { %v4646_v26 = vadd.f32 %v2815_v25, %v2814_v20  ;;  %1664 = vrot.lane.b32.xlu0 %v4644_v19, %s5035_s7 }
 0x2b7   : > { %v2662_v52 = vpack.c.bf16 %v2874_v45, %v2871_v36 }
 0x2b8   : > { %1666 = vrot.lane.b32.xlu1 %v4646_v26, %s5035_s7 }
 0x2b9   : > { %2692 = vst [vmem:[%s4614_s20 + $0x28] sm:$0xff] %v2662_v52   ;;  %v2875_v54 = vpop.f32.mrb[40].mxu0 }
 0x2ba   : > { %v2817_v33 = vpop.f32.mrb[44].mxu1  ;;  %v2876_v55 = vpop.f32.mrb[41].mxu0 }
 0x2bb   : > { %v2818_v38 = vpop.f32.mrb[45].mxu1  ;;  %v2877_v57 = vadd.f32 %v2876_v55, %v2875_v54  ;;  %v2878_v58 = vpop.f32.mrb[42].mxu0  ;;  %v1498_v55 = vld [vmem:[%s4371_s16 + $0x10] sm:$0xff] }
 0x2bc   : > { %v4653_v42 = vadd.f32 %v2818_v38, %v2817_v33  ;;  %v2820_v44 = vpop.f32.mrb[46].mxu1  ;;  %v2879_v60 = vpop.f32.mrb[43].mxu0  ;;  %v1545_v33 = vmul.f32 %v4528_v10, %v1481_v18  ;;  %v1489_v38 = vld [vmem:[%s4364_s10 + $0x48] sm:$0xff]  ;;  %v1491_v18 = vld [vmem:[%s4364_s10 + $0x58] sm:$0xff] }
 0x2bd   : > { %v2821_v48 = vpop.f32.mrb[47].mxu1  ;;  %v2880_v61 = vadd.f32 %v2879_v60, %v2878_v58  ;;  %v1553_v4 = vmul.f32 %v4530_v11, %v1489_v38  ;;  %v1482_v60 = vld [vmem:[%s4364_s10 + $0x10] sm:$0xff]  ;;  %v1484_v38 = vld [vmem:[%s4364_s10 + $0x20] sm:$0xff] }
 0x2be   : > { %v4655_v51 = vadd.f32 %v2821_v48, %v2820_v44  ;;  %1668 = vrot.lane.b32.xlu0 %v4653_v42, %s5035_s7  ;;  %v1505_v44 = vld [vmem:[%s4371_s16 + $0x48] sm:$0xff]  ;;  %v1506_v11 = vld [vmem:[%s4371_s16 + $0x50] sm:$0xff] }
 0x2bf   : > { %v2667_v63 = vpack.c.bf16 %v2880_v61, %v2877_v57  ;;  %v1552_v57 = vmul.f32 %v4526_v5, %v1488_v37  ;;  %v1483_v61 = vld [vmem:[%s4364_s10 + $0x18] sm:$0xff] }
 0x2c0   : > { %1670 = vrot.lane.b32.xlu1 %v4655_v51, %s5035_s7 }
 0x2c1   : > { %2693 = vst [vmem:[%s4614_s20 + $0x30] sm:$0xff] %v2667_v63   ;;  %v2881_v0 = vpop.f32.mrb[44].mxu0 }
 0x2c2   : > { %1588 = vrot.lane.b32.xlu0 %v4572_v41, %s5035_s7  ;;  %v2882_v1 = vpop.f32.mrb[45].mxu0 }
 0x2c3   : > { %v2883_v6 = vadd.f32 %v2882_v1, %v2881_v0  ;;  %v2884_v7 = vpop.f32.mrb[46].mxu0  ;;  %v1499_v0 = vld [vmem:[%s4371_s16 + $0x18] sm:$0xff] }
 0x2c4   : > { %1590 = vrot.lane.b32.xlu1 %v4578_v47, %s5035_s7  ;;  %v2885_v8 = vpop.f32.mrb[47].mxu0 }
 0x2c5   : > { %v2886_v12 = vadd.f32 %v2885_v8, %v2884_v7  ;;  %v1546_v8 = vmul.f32 %v4538_v16, %v1482_v60  ;;  %v1554_v16 = vmul.f32 %v4540_v17, %v1490_v15  ;;  %v1548_v17 = vmul.f32 %v4554_v28, %v1484_v38  ;;  %v1493_v60 = vld [vmem:[%s4364_s10 + $0x68] sm:$0xff]  ;;  %v1503_v15 = vld [vmem:[%s4371_s16 + $0x38] sm:$0xff] }
 0x2c6   : > { %v1513_v38 = vld [vmem:[%s4377_s17 + $0x8] sm:$0xff] }
 0x2c7   : > { %v2672_v13 = vpack.c.bf16 %v2886_v12, %v2883_v6  ;;  %v1547_v12 = vmul.f32 %v4544_v22, %v1483_v61  ;;  %v1555_v22 = vmul.f32 %v4546_v23, %v1491_v18 }
 0x2c9   : > { %2694 = vst [vmem:[%s4614_s20 + $0x38] sm:$0xff] %v2672_v13  }
 0x2d8   : > { %v1561_v20 = vpop.permute.xlu0 %1560 }
 0x2d9   : > { %v1592_v25 = vmul.f32 %v1561_v20, %v1496_v14 }
 0x2da   : > { %v1563_v27 = vpop.permute.xlu1 %1562 }
 0x2db   : > { %v1593_v36 = vmul.f32 %v1563_v27, %v1497_v21  ;;  %v1608_v45 = vadd.f32 %v1592_v25, %v1544_v32  ;;  %v1507_v21 = vld [vmem:[%s4371_s16 + $0x58] sm:$0xff] }
 0x2dc   : > { %v1577_v39 = vpop.permute.xlu0 %1576 }
 0x2dd   : > { %v1609_v48 = vadd.f32 %v1593_v36, %v1545_v33  ;;  %v1600_v52 = vmul.f32 %v1577_v39, %v1504_v31  ;;  %v1500_v33 = vld [vmem:[%s4371_s16 + $0x20] sm:$0xff]  ;;  %v1485_v39 = vld [vmem:[%s4364_s10 + $0x28] sm:$0xff] }
 0x2de   : > { %v1579_v54 = vpop.permute.xlu1 %1578  ;;  %v1549_v23 = vmul.f32 %v4560_v34, %v1485_v39  ;;  %v1557_v34 = vmul.f32 %v4562_v35, %v1493_v60  ;;  %v1529_v39 = vld [vmem:[%s4379_s29 + $0x8] sm:$0xff] }
 0x2df   : > { %v2557_v58 = vpack.c.bf16 %v1609_v48, %v1608_v45  ;;  %v1601_v10 = vmul.f32 %v1579_v54, %v1505_v44  ;;  %v1616_v1 = vadd.f32 %v1600_v52, %v1552_v57  ;;  %v1501_v45 = vld [vmem:[%s4371_s16 + $0x28] sm:$0xff]  ;;  %v1508_v57 = vld [vmem:[%s4371_s16 + $0x60] sm:$0xff] }
 0x2e0   : > { %v1565_v63 = vpop.permute.xlu0 %1564 }
 0x2e1   : > { %2558 = vst [vmem:[%s4685_s12] sm:$0xff] %v2557_v58   ;;  %v1617_v6 = vadd.f32 %v1601_v10, %v1553_v4  ;;  %v1594_v7 = vmul.f32 %v1565_v63, %v1498_v55  ;;  %v1492_v10 = vld [vmem:[%s4364_s10 + $0x60] sm:$0xff]  ;;  %v1509_v63 = vld [vmem:[%s4371_s16 + $0x68] sm:$0xff] }
 0x2e2   : > { %v1567_v5 = vpop.permute.xlu1 %1566  ;;  %v1556_v28 = vmul.f32 %v4556_v29, %v1492_v10 }
 0x2e3   : > { %v2577_v13 = vpack.c.bf16 %v1617_v6, %v1616_v1  ;;  %v1595_v14 = vmul.f32 %v1567_v5, %v1499_v0  ;;  %v1610_v25 = vadd.f32 %v1594_v7, %v1546_v8  ;;  %v1502_v5 = vld [vmem:[%s4371_s16 + $0x30] sm:$0xff] }
 0x2e4   : > { %v1581_v20 = vpop.permute.xlu0 %1580 }
 0x2e5   : > { %2677 = vst [vmem:[%s4685_s12 + $0x20] sm:$0xff] %v2577_v13   ;;  %v1611_v27 = vadd.f32 %v1595_v14, %v1547_v12  ;;  %v1602_v31 = vmul.f32 %v1581_v20, %v1506_v11  ;;  %v1486_v12 = vld [vmem:[%s4364_s10 + $0x30] sm:$0xff]  ;;  %v1487_v13 = vld [vmem:[%s4364_s10 + $0x38] sm:$0xff] }
 0x2e6   : > { %v1583_v32 = vpop.permute.xlu1 %1582  ;;  %v1550_v29 = vmul.f32 %v4570_v40, %v1486_v12  ;;  %v1551_v35 = vmul.f32 %v4576_v46, %v1487_v13 }
 0x2e7   : > { %v2562_v36 = vpack.c.bf16 %v1611_v27, %v1610_v25  ;;  %v1603_v37 = vmul.f32 %v1583_v32, %v1507_v21  ;;  %v1618_v48 = vadd.f32 %v1602_v31, %v1554_v16 }
 0x2e8   : > { %v1569_v44 = vpop.permute.xlu0 %1568 }
 0x2e9   : > { %2674 = vst [vmem:[%s4685_s12 + $0x8] sm:$0xff] %v2562_v36   ;;  %v1619_v52 = vadd.f32 %v1603_v37, %v1555_v22  ;;  %v1596_v54 = vmul.f32 %v1569_v44, %v1500_v33  ;;  %v1528_v22 = vld [vmem:[%s4379_s29] sm:$0xff] }
 0x2ea   : > { %v1571_v55 = vpop.permute.xlu1 %1570  ;;  %v1512_v37 = vld [vmem:[%s4377_s17] sm:$0xff] }
 0x2eb   : > { %v2582_v4 = vpack.c.bf16 %v1619_v52, %v1618_v48  ;;  %v1597_v58 = vmul.f32 %v1571_v55, %v1501_v45  ;;  %v1612_v0 = vadd.f32 %v1596_v54, %v1548_v17  ;;  %v1624_v46 = vmul.f32 %v4584_v50, %v1512_v37  ;;  %v1530_v55 = vld [vmem:[%s4379_s29 + $0x10] sm:$0xff]  ;;  %v1521_v37 = vld [vmem:[%s4377_s17 + $0x48] sm:$0xff] }
 0x2ec   : > { %v1585_v61 = vpop.permute.xlu0 %1584  ;;  %v1625_v45 = vmul.f32 %v4586_v53, %v1513_v38 }
 0x2ed   : > { %2678 = vst [vmem:[%s4685_s12 + $0x28] sm:$0xff] %v2582_v4   ;;  %v1613_v1 = vadd.f32 %v1597_v58, %v1549_v23  ;;  %v1604_v6 = vmul.f32 %v1585_v61, %v1508_v57  ;;  %v1514_v23 = vld [vmem:[%s4377_s17 + $0x10] sm:$0xff]  ;;  %v1515_v4 = vld [vmem:[%s4377_s17 + $0x18] sm:$0xff] }
 0x2ee   : > { %v1587_v7 = vpop.permute.xlu1 %1586  ;;  %v1531_v58 = vld [vmem:[%s4379_s29 + $0x18] sm:$0xff]  ;;  %v1626_v53 = vmul.f32 %v4592_v56, %v1514_v23  ;;  %v1627_v60 = vmul.f32 %v4594_v59, %v1515_v4 }
 0x2ef   : > { %v2567_v11 = vpack.c.bf16 %v1613_v1, %v1612_v0  ;;  %v1605_v8 = vmul.f32 %v1587_v7, %v1509_v63  ;;  %v1620_v18 = vadd.f32 %v1604_v6, %v1556_v28  ;;  %v1532_v63 = vld [vmem:[%s4379_s29 + $0x20] sm:$0xff]  ;;  %v1517_v7 = vld [vmem:[%s4377_s17 + $0x28] sm:$0xff]  ;;  %v1539_v23 = vld [vmem:[%s4379_s29 + $0x58] sm:$0xff] }
 0x2f0   : > { %v1573_v14 = vpop.permute.xlu0 %1572  ;;  %v1516_v6 = vld [vmem:[%s4377_s17 + $0x20] sm:$0xff]  ;;  %v1533_v28 = vld [vmem:[%s4379_s29 + $0x28] sm:$0xff]  ;;  %v1629_v59 = vmul.f32 %v4607_v9, %v1517_v7 }
 0x2f1   : > { %2675 = vst [vmem:[%s4685_s12 + $0x10] sm:$0xff] %v2567_v11   ;;  %v1621_v20 = vadd.f32 %v1605_v8, %v1557_v34  ;;  %v1598_v21 = vmul.f32 %v1573_v14, %v1502_v5  ;;  %v1628_v56 = vmul.f32 %v4601_v3, %v1516_v6  ;;  %v1541_v6 = vld [vmem:[%s4379_s29 + $0x68] sm:$0xff] }
 0x2f2   : > { %v1575_v25 = vpop.permute.xlu1 %1574 }
 0x2f3   : > { %v2587_v27 = vpack.c.bf16 %v1621_v20, %v1620_v18  ;;  %v1599_v31 = vmul.f32 %v1575_v25, %v1503_v15  ;;  %v1614_v32 = vadd.f32 %v1598_v21, %v1550_v29  ;;  %v1534_v15 = vld [vmem:[%s4379_s29 + $0x30] sm:$0xff]  ;;  %v1519_v21 = vld [vmem:[%s4377_s17 + $0x38] sm:$0xff] }
 0x2f4   : > { %v1518_v20 = vld [vmem:[%s4377_s17 + $0x30] sm:$0xff]  ;;  %v1535_v29 = vld [vmem:[%s4379_s29 + $0x38] sm:$0xff] }
 0x2f5   : > { %2679 = vst [vmem:[%s4685_s12 + $0x30] sm:$0xff] %v2587_v27   ;;  %v1615_v33 = vadd.f32 %v1599_v31, %v1551_v35  ;;  %v1630_v9 = vmul.f32 %v4617_v24, %v1518_v20  ;;  %v1631_v27 = vmul.f32 %v4619_v30, %v1519_v21  ;;  %v1633_v30 = vmul.f32 %v4628_v49, %v1521_v37 }
 0x2f7   : > { %v2572_v16 = vpack.c.bf16 %v1615_v33, %v1614_v32 }
 0x2f8   : > { %v1641_v36 = vpop.permute.xlu0 %1640 }
 0x2f9   : > { %2676 = vst [vmem:[%s4685_s12 + $0x18] sm:$0xff] %v2572_v16   ;;  %v1672_v40 = vmul.f32 %v1641_v36, %v1528_v22  ;;  %v1536_v16 = vld [vmem:[%s4379_s29 + $0x40] sm:$0xff] }
 0x2fa   : > { %v1520_v36 = vld [vmem:[%s4377_s17 + $0x40] sm:$0xff] }
 0x2fb   : > { %v1688_v52 = vadd.f32 %v1672_v40, %v1624_v46  ;;  %v1632_v24 = vmul.f32 %v4626_v43, %v1520_v36 }
 0x2fc   : > { %v1643_v44 = vpop.permute.xlu0 %1642 }
 0x2fd   : > { %v1673_v48 = vmul.f32 %v1643_v44, %v1529_v39  ;;  %v1537_v39 = vld [vmem:[%s4379_s29 + $0x48] sm:$0xff] }
 0x2ff   : > { %v1689_v54 = vadd.f32 %v1673_v48, %v1625_v45 }
 0x300   : > { %v1645_v57 = vpop.permute.xlu1 %1644 }
 0x301   : > { %v2597_v17 = vpack.c.bf16 %v1689_v54, %v1688_v52  ;;  %v1674_v50 = vmul.f32 %v1645_v57, %v1530_v55  ;;  %v1538_v52 = vld [vmem:[%s4379_s29 + $0x50] sm:$0xff]  ;;  %v1523_v57 = vld [vmem:[%s4377_s17 + $0x58] sm:$0xff] }
 0x302   : > { %v1522_v55 = vld [vmem:[%s4377_s17 + $0x50] sm:$0xff]  ;;  %v1635_v49 = vmul.f32 %v4637_v2, %v1523_v57 }
 0x303   : > { %2598 = vst [vmem:[%s4731_s22] sm:$0xff] %v2597_v17   ;;  %v1690_v0 = vadd.f32 %v1674_v50, %v1626_v53  ;;  %v1634_v43 = vmul.f32 %v4635_v62, %v1522_v55 }
 0x304   : > { %v1647_v10 = vpop.permute.xlu1 %1646 }
 0x305   : > { %v1675_v61 = vmul.f32 %v1647_v10, %v1531_v58 }
 0x307   : > { %v1691_v1 = vadd.f32 %v1675_v61, %v1627_v60  ;;  %v1540_v60 = vld [vmem:[%s4379_s29 + $0x60] sm:$0xff] }
 0x308   : > { %v1649_v5 = vpop.permute.xlu0 %1648 }
 0x309   : > { %v2602_v34 = vpack.c.bf16 %v1691_v1, %v1690_v0  ;;  %v1676_v11 = vmul.f32 %v1649_v5, %v1532_v63  ;;  %v1524_v63 = vld [vmem:[%s4377_s17 + $0x60] sm:$0xff]  ;;  %v1525_v0 = vld [vmem:[%s4377_s17 + $0x68] sm:$0xff] }
 0x30a   : > { %v1651_v8 = vpop.permute.xlu1 %1650  ;;  %v1636_v7 = vmul.f32 %v4644_v19, %v1524_v63  ;;  %v1637_v5 = vmul.f32 %v4646_v26, %v1525_v0  ;;  %v1543_v19 = vld [vmem:[%s4379_s29 + $0x78] sm:$0xff] }
 0x30b   : > { %2681 = vst [vmem:[%s4731_s22 + $0x8] sm:$0xff] %v2602_v34   ;;  %v1677_v12 = vmul.f32 %v1651_v8, %v1533_v28  ;;  %v1692_v13 = vadd.f32 %v1676_v11, %v1628_v56  ;;  %v1542_v8 = vld [vmem:[%s4379_s29 + $0x70] sm:$0xff]  ;;  %s2012_s29 = sshll.u32 %s4614_s20, 4  ;;  %s4797_s29 = int_to_ptr.vmem [resolvable:$true] %s2012_s29 }
 0x30d   : > { %v1693_v14 = vadd.f32 %v1677_v12, %v1629_v59  ;;  %v1526_v59 = vld [vmem:[%s4377_s17 + $0x70] sm:$0xff]  ;;  %v1527_v12 = vld [vmem:[%s4377_s17 + $0x78] sm:$0xff]  ;;  %s2487_s17 = sshll.u32 %s1969_s4, 6  ;;  %s5151_s4 = sld [smem:[#allocation63_spill]] }
 0x30e   : > { %v1639_v20 = vmul.f32 %v4655_v51, %v1527_v12  ;;  %s4795_s2 = scalar_lea.hbm %s5149_s27, %s2487_s17  ;;  %s4810_s8 = scalar_lea.hbm %s5152_s1, %s2487_s17 }
 0x30f   : > { %v2607_v18 = vpack.c.bf16 %v1693_v14, %v1692_v13  ;;  %s3714_s27 = smov [#allocation17]  }
 0x310   : > { %v1653_v25 = vpop.permute.xlu0 %1652  ;;  %s3437_s20 = sshll.u32 %s3714_s27, 4  ;;  %s3438_s20 = int_to_ptr.vmem [resolvable:$false] %s3437_s20 }
 0x311   : > { %2682 = vst [vmem:[%s4731_s22 + $0x10] sm:$0xff] %v2607_v18   ;;  %v1678_v35 = vmul.f32 %v1653_v25, %v1534_v15  ;;  %v1510_v15 = vld [vmem:[%s4371_s16 + $0x70] sm:$0xff]  ;;  %v1638_v18 = vmul.f32 %v4653_v42, %v1526_v59  ;;  %s3439_s21 = scalar_lea.vmem %s3438_s20, 2048  ;;  %p3440_p0 = scmp.lt.s32.totalorder %s4787_s26, %s3438_s20 }
 0x312   : > { %v1655_v3 = vpop.permute.xlu1 %1654  ;;  %v1494_v25 = vld [vmem:[%s4364_s10 + $0x70] sm:$0xff] }
 0x313   : > { %v1679_v31 = vmul.f32 %v1655_v3, %v1535_v29  ;;  %v1694_v32 = vadd.f32 %v1678_v35, %v1630_v9  ;;  %v1495_v29 = vld [vmem:[%s4364_s10 + $0x78] sm:$0xff]  ;;  %v1558_v51 = vmul.f32 %v4572_v41, %v1494_v25  ;;  %s4802_s3 = scalar_lea.hbm %s5151_s4, %s2487_s17  ;;  %s5040_s10 = scalar_lea.sflag [#allocation18], %s4344_s14 }
 0x314   : > { %v1511_v3 = vld [vmem:[%s4371_s16 + $0x78] sm:$0xff]  ;;  %s3433_s16 = scalar_lea.vmem %s4787_s26, 1024 }
 0x315   : > { %v1695_v33 = vadd.f32 %v1679_v31, %v1631_v27  ;;  %p3434_p10 = scmp.ne.s32.totalorder %s4787_s26, %s3433_s16  ;;  %p3441_p3 = scmp.lt.s32.totalorder %s3439_s21, %s3433_s16 }
 0x317   : > { %v2612_v22 = vpack.c.bf16 %v1695_v33, %v1694_v32  ;;  %v1559_v32 = vmul.f32 %v4578_v47, %v1495_v29  ;;  %p3435_p2 = pnand %p3434_p10, %p5153_p12  ;;  %p3442_p13 = por %p3441_p3, %p3440_p0 }
 0x318   : > { %v1657_v38 = vpop.permute.xlu0 %1656 }
 0x319   : > { %2683 = vst [vmem:[%s4731_s22 + $0x18] sm:$0xff] %v2612_v22   ;;  %v1680_v40 = vmul.f32 %v1657_v38, %v1536_v16  ;;  %p3436_p4 = pneg %p3435_p2 }
 0x31a   : > { %v1659_v44 = vpop.permute.xlu1 %1658 }
 0x31b   : > { %v1681_v46 = vmul.f32 %v1659_v44, %v1537_v39  ;;  %v1696_v45 = vadd.f32 %v1680_v40, %v1632_v24  ;;  %p3443_p9 = pnand %p3442_p13, %p3436_p4 }
 0x31d   : > { %v1697_v48 = vadd.f32 %v1681_v46, %v1633_v30 }
 0x31f   : > { %v2617_v54 = vpack.c.bf16 %v1697_v48, %v1696_v45 }
 0x320   : > { %v1661_v17 = vpop.permute.xlu0 %1660 }
 0x321   : > { %2684 = vst [vmem:[%s4731_s22 + $0x20] sm:$0xff] %v2617_v54   ;;  %v1682_v4 = vmul.f32 %v1661_v17, %v1538_v52 }
 0x322   : > { %v1663_v58 = vpop.permute.xlu1 %1662 }
 0x323   : > { %v1683_v50 = vmul.f32 %v1663_v58, %v1539_v23  ;;  %v1698_v10 = vadd.f32 %v1682_v4, %v1634_v43 }
 0x325   : > { %v1699_v53 = vadd.f32 %v1683_v50, %v1635_v49 }
 0x327   : > { %v2622_v61 = vpack.c.bf16 %v1699_v53, %v1698_v10 }
 0x328   : > { %v1665_v1 = vpop.permute.xlu0 %1664 }
 0x329   : > { %2685 = vst [vmem:[%s4731_s22 + $0x28] sm:$0xff] %v2622_v61   ;;  %v1684_v62 = vmul.f32 %v1665_v1, %v1540_v60 }
 0x32a   : > { %v1667_v2 = vpop.permute.xlu1 %1666 }
 0x32b   : > { %v1685_v28 = vmul.f32 %v1667_v2, %v1541_v6  ;;  %v1700_v34 = vadd.f32 %v1684_v62, %v1636_v7 }
 0x32d   : > { %v1701_v11 = vadd.f32 %v1685_v28, %v1637_v5 }
 0x32f   : > { %v2627_v56 = vpack.c.bf16 %v1701_v11, %v1700_v34 }
 0x330   : > { %v1669_v13 = vpop.permute.xlu0 %1668 }
 0x331   : > { %2686 = vst [vmem:[%s4731_s22 + $0x30] sm:$0xff] %v2627_v56   ;;  %v1686_v26 = vmul.f32 %v1669_v13, %v1542_v8 }
 0x332   : > { %v1671_v14 = vpop.permute.xlu1 %1670 }
 0x333   : > { %v1687_v21 = vmul.f32 %v1671_v14, %v1543_v19  ;;  %v1702_v9 = vadd.f32 %v1686_v26, %v1638_v18 }
 0x334   : > { %v1589_v35 = vpop.permute.xlu0 %1588 }
 0x335   : > { %v1703_v27 = vadd.f32 %v1687_v21, %v1639_v20  ;;  %v1606_v31 = vmul.f32 %v1589_v35, %v1510_v15 }
 0x336   : > { %v1591_v42 = vpop.permute.xlu1 %1590 }
 0x337   : > { %v2632_v33 = vpack.c.bf16 %v1703_v27, %v1702_v9  ;;  %v1607_v16 = vmul.f32 %v1591_v42, %v1511_v3  ;;  %v1622_v41 = vadd.f32 %v1606_v31, %v1558_v51 }
 0x339   : > { %2687 = vst [vmem:[%s4731_s22 + $0x38] sm:$0xff] %v2632_v33   ;;  %v1623_v47 = vadd.f32 %v1607_v16, %v1559_v32 }
 0x33a   : > { %3446 = shalt.err (!%p3443_p9)
}
 0x33b   : > { %s3447_s0 = scalar_lea.hbm %s4795_s2, 1024  ;;  %s3451_s17 = scalar_lea.hbm %s5150_s6, 8192 }
 0x33c   : > { %p3448_p7 = scmp.ne.s32.totalorder %s4795_s2, %s3447_s0  ;;  %p3452_p5 = scmp.lt.u32.totalorder %s4795_s2, %s5150_s6 }
 0x33d   : > { %p3453_p1 = scmp.lt.u32.totalorder %s3451_s17, %s3447_s0  ;;  %p3455_p10 = scmp.lt.u32.totalorder %s3447_s0, %s4795_s2 }
 0x33e   : > { %p3449_p11 = pnand %p3448_p7, %p5153_p12 }
 0x33f   : > { %p3454_p6 = por %p3453_p1, %p3452_p5 }
 0x340   : > { %p3450_p8 = pneg %p3449_p11 }
 0x341   : > { %p3456_p2 = por %p3455_p10, %p3454_p6 }
 0x343   : > { %p3457_p4 = pnand %p3456_p2, %p3450_p8 }
 0x345   : > { %3460 = shalt.err (!%p3457_p4)
}
 0x346   : > { %s3715_s16 = smov 128   ;;  %s3716_s21 = smov 4   ;;  %v2592_v22 = vpack.c.bf16 %v1623_v47, %v1622_v41 }
 0x347   : > { %s5154_s7 = smov 64   ;;  %s3461_s0 = scalar_lea.vmem %s4797_s29, 1024 }
 0x348   : > { %2920 = dma.vmem_to_hbm [thread:$0]  (%p5153_p12), %s4787_s26, 1024, %s4795_s2, %s5040_s10, %s5154_s7, %s3715_s16, %s3716_s21  }
 0x349   : > { %p3462_p0 = scmp.ne.s32.totalorder %s4797_s29, %s3461_s0  ;;  %s3717_s22 = smov [#allocation19]  }
 0x34a   : > { %s3465_s17 = sshll.u32 %s3717_s22, 4  ;;  %s3466_s17 = int_to_ptr.vmem [resolvable:$false] %s3465_s17 }
 0x34b   : > { %p3463_p3 = pnand %p3462_p0, %p5153_p12  ;;  %s3467_s27 = scalar_lea.vmem %s3466_s17, 2048 }
 0x34c   : > { %p3468_p9 = scmp.lt.s32.totalorder %s4797_s29, %s3466_s17  ;;  %p3469_p7 = scmp.lt.s32.totalorder %s3467_s27, %s3461_s0 }
 0x34d   : > { %p3464_p13 = pneg %p3463_p3 }
 0x34e   : > { %p3470_p11 = por %p3469_p7, %p3468_p9 }
 0x350   : > { %p3471_p8 = pnand %p3470_p11, %p3464_p13 }
 0x352   : > { %3474 = shalt.err (!%p3471_p8)
}
 0x353   : > { %s3475_s26 = scalar_lea.hbm %s4802_s3, 1024  ;;  %s3479_s22 = scalar_lea.hbm %s5151_s4, 8192 }
 0x354   : > { %p3476_p5 = scmp.ne.s32.totalorder %s4802_s3, %s3475_s26  ;;  %p3480_p10 = scmp.lt.u32.totalorder %s4802_s3, %s5151_s4 }
 0x355   : > { %p3481_p2 = scmp.lt.u32.totalorder %s3479_s22, %s3475_s26  ;;  %p3483_p0 = scmp.lt.u32.totalorder %s3475_s26, %s4802_s3 }
 0x356   : > { %p3477_p1 = pnand %p3476_p5, %p5153_p12 }
 0x357   : > { %p3482_p4 = por %p3481_p2, %p3480_p10 }
 0x358   : > { %p3478_p6 = pneg %p3477_p1 }
 0x359   : > { %p3484_p3 = por %p3483_p0, %p3482_p4 }
 0x35b   : > { %p3485_p13 = pnand %p3484_p3, %p3478_p6 }
 0x35d   : > { %3488 = shalt.err (!%p3485_p13)
}
 0x35e   : > { %s5155_s0 = scalar_lea.sflag [#allocation18], %s4344_s14  ;;  %2680 = vst [vmem:[%s4685_s12 + $0x38] sm:$0xff] %v2592_v22   ;;  %s5156_s10 = sand.u32 1, %s5144_s25  }
 0x35f   : > { %2921 = dma.vmem_to_hbm [thread:$0]  (%p5153_p12), %s4797_s29, 1024, %s4802_s3, %s5155_s0, %s5154_s7, %s3715_s16, %s3716_s21  }
 0x360   : > { %s4868_s27 = scalar_lea.sflag [#allocation4], %s5156_s10  ;;  %s3489_s26 = scalar_lea.vmem %s4804_s19, 1024 }
 0x361   : > { %p3490_p9 = scmp.ne.s32.totalorder %s4804_s19, %s3489_s26  ;;  %s3718_s2 = smov [#allocation16]  }
 0x362   : > { %s3493_s14 = sshll.u32 %s3718_s2, 4  ;;  %s3494_s14 = int_to_ptr.vmem [resolvable:$false] %s3493_s14 }
 0x363   : > { %p3491_p7 = pnand %p3490_p9, %p5153_p12  ;;  %s3495_s20 = scalar_lea.vmem %s3494_s14, 2048 }
 0x364   : > { %p3496_p8 = scmp.lt.s32.totalorder %s4804_s19, %s3494_s14  ;;  %p3497_p5 = scmp.lt.s32.totalorder %s3495_s20, %s3489_s26 }
 0x365   : > { %p3492_p11 = pneg %p3491_p7 }
 0x366   : > { %p3498_p1 = por %p3497_p5, %p3496_p8 }
 0x368   : > { %p3499_p6 = pnand %p3498_p1, %p3492_p11 }
 0x36a   : > { %3502 = shalt.err (!%p3499_p6)
}
 0x36b   : > { %s3503_s25 = scalar_lea.hbm %s4810_s8, 1024  ;;  %s3507_s29 = scalar_lea.hbm %s5152_s1, 8192 }
 0x36c   : > { %p3504_p10 = scmp.ne.s32.totalorder %s4810_s8, %s3503_s25  ;;  %p3508_p0 = scmp.lt.u32.totalorder %s4810_s8, %s5152_s1 }
 0x36d   : > { %p3509_p3 = scmp.lt.u32.totalorder %s3507_s29, %s3503_s25  ;;  %p3511_p9 = scmp.lt.u32.totalorder %s3503_s25, %s4810_s8 }
 0x36e   : > { %p3505_p2 = pnand %p3504_p10, %p5153_p12 }
 0x36f   : > { %p3510_p13 = por %p3509_p3, %p3508_p0 }
 0x370   : > { %p3506_p4 = pneg %p3505_p2 }
 0x371   : > { %p3512_p7 = por %p3511_p9, %p3510_p13 }
 0x373   : > { %p3513_p11 = pnand %p3512_p7, %p3506_p4 }
 0x375   : > { %3516 = shalt.err (!%p3513_p11)
}
 0x376   : > { %2919 = dma.vmem_to_hbm [thread:$0]  (%p5153_p12), %s4804_s19, 1024, %s4810_s8, %s4868_s27, %s5154_s7, %s3715_s16, %s3716_s21  }
 0x377 PF: > { %s5157_s0 = sld [smem:[#allocation28_spill]]  ;;  %p2961_p8 = scmp.ge.s32.totalorder %s3699_s11, 2 }
 0x378   : > { %p5158_p5 = scmp.ne.s32.totalorder %s5110_s5, 0 }
 0x37a   : > { %p2951_p1 = pnand %p2961_p8, %p5158_p5 }
 0x37d   : > { %s2027_s10 = sand.u32 1, %s5157_s0  }
 0x37e   : > { %s2028_s26 = scalar_lea.sflag [#allocation4], %s2027_s10 }
 0x37f   : > { %3618 = dma.done.wait (!%p2951_p1), %s2028_s26, 1024  }
 0x380   : > { %3620 = vsyncadd (!%p2951_p1), %s2028_s26, 4294966272  ;;  %s5159_s13 = sadd.s32 4294967294, %s3699_s11  }
 0x381   : > { %s2036_s2 = sand.u32 1, %s5159_s13  }
 0x382   : > { %s2037_s14 = scalar_lea.sflag [#allocation18], %s2036_s2 }
 0x383   : > { %3622 = dma.done.wait (!%p2951_p1), %s2037_s14, 2048  }
 0x384   : > { %3624 = vsyncadd (!%p2951_p1), %s2037_s14, 4294965248  ;;  %s42_s11 = sadd.s32 1, %s3699_s11   ;;  %s5161_s13 = sld [smem:[#allocation29_spill]] }
 0x385   : > { %p4902_p12 = scmp.ge.s32.totalorder %s42_s11, 10   ;;  %s5162_s14 = sld [smem:[#allocation30_spill]] }
 0x386   : > { %s5163_s16 = sld [smem:[#allocation31_spill]]  ;;  %s5165_s19 = sld [smem:[#allocation32_spill]] }
 0x387   : > { %s5164_s5 = sld [smem:[#allocation50_spill]]  ;;  %s5166_s20 = sld [smem:[#allocation33_spill]] }
 0x388   : > { %s5167_s21 = sld [smem:[#allocation49_spill]]  ;;  %s5168_s7 = sld [smem:[#allocation51_spill]] }
 0x389   : > { %s5169_s26 = sld [smem:[#allocation37_spill]]  ;;  %s5170_s3 = sld [smem:[#allocation39_spill]] }
 0x38a   : > { %s5171_s29 = sld [smem:[#allocation46_spill]]  ;;  %s5172_s12 = sld [smem:[#allocation48_spill]] }
 0x38b   : > { %s5173_s17 = smov %s3647_s18  ;;  %s5175_s22 = smov %s3667_s23 }
 0x38c   : > { %s5176_s23 = smov %s3671_s24  ;;  %s5178_s25 = smov %s3687_s28 }
 0x38d   : > { %s5174_s18 = smov %s5164_s5  ;;  %s5179_s27 = smov %s3695_s30 }
 0x38e   : > { %s5177_s24 = smov %s5168_s7  ;;  %41 = sbr.rel (!%p4902_p12) target bundleno = 35 (0x23), region = 214 }
 0x38f   : > { %s5180_s28 = smov %s5170_s3 }
 0x390   : > { %s5181_s30 = smov %s5172_s12 }
 0x395   :  { %2051 = vsyncpa [#allocation3], 1 }
 0x396   :  { %2053 = vsyncpa [#allocation3 + $0x1], 1 }
 0x397   :  { %2054 = vsyncpa [#allocation6], 1 }
 0x398   :  { %2056 = vsyncpa [#allocation6 + $0x1], 1 }
 0x399   :  { %2057 = vsyncpa [#allocation9], 1 }
 0x39a   :  { %2059 = vsyncpa [#allocation9 + $0x1], 1 }
 0x39b   :  { %2060 = vsyncpa [#allocation12], 1 }
 0x39c   :  { %2062 = vsyncpa [#allocation12 + $0x1], 1 }
 0x39d   :  { %2063 = vsyncpa [#allocation15], 1 }
 0x39e   :  { %2065 = vsyncpa [#allocation15 + $0x1], 1 }
 0x39f   :  { %2066 = vsyncpa [#allocation4], 1 }
 0x3a0   :  { %2068 = vsyncpa [#allocation4 + $0x1], 1 }
 0x3a1   :  { %2069 = vsyncpa [#allocation18], 1 }
 0x3a2   :  { %2071 = vsyncpa [#allocation18 + $0x1], 1 }

</bundles_post_ra>
